<compile_context>
chip_gen: v5e
topology: v5e:2x2
jax: 0.10.0
libtpu: 0.0.40
codegen_flags: <defaults>
</compile_context>

<pallas_src>
import numpy as np
import jax
import jax.numpy as jnp
from jax.experimental import pallas as pl
from jax.experimental.pallas import tpu as pltpu

C0 = 299792458.0          # speed of light [m/s]
_ATT_TOTAL_CLAMP = 30.0   # clamp on cumulative |Im(delta)| over the whole stack
                          # (|den|^2 ~ exp(2*30) ~ 1.1e26 stays finite in f32)
_TB_SPEC = 8              # candidate rows per TMM-spectrum grid step


def _spectrum_kernel(params_ref,   # VMEM (8, 3L)  : per-candidate (n, k, D)
                     xre_ref,      # VMEM (1, Kp)  : Re{rfft(reference_pulse)}
                     xim_ref,      # VMEM (1, Kp)  : Im{rfft(reference_pulse)}
                     omega_ref,    # VMEM (1, Kp)  : non-negative angular freqs
                     spec_ref):    # VMEM (8, 2Kp) : packed [Re(Y) | Im(Y)] (out)
    TB = params_ref.shape[0]
    L = params_ref.shape[1] // 3
    Kp = omega_ref.shape[1]
    # frequency chunking bounds the TMM live set (~30 (TB,F) f32 arrays) to the vregs
    F = 256 if (Kp % 256 == 0 and Kp >= 256) else 128
    p = params_ref[...]                                        # (TB, 3L)

    for c in range(Kp // F):
        lo, hi = c * F, (c + 1) * F
        w_over_c = omega_ref[:, lo:hi] * (1.0 / C0)            # (1, F)

        M = None               # 2x2 complex characteristic matrix per (cand, freq)
        d_total = None
        att = jnp.zeros((TB, F), jnp.float32)                  # cumulative |Im(delta)|

        for l in range(L):
            n = p[:, 3 * l + 0:3 * l + 1]                      # (TB, 1)
            k = p[:, 3 * l + 1:3 * l + 2]
            d = p[:, 3 * l + 2:3 * l + 3]
            d_total = d if d_total is None else d_total + d
            keff = -k     # e^{+i w t} synthesis convention -> n_tilde = n - i k

            d_re = (n * d) * w_over_c                          # (TB, F)
            att_left = _ATT_TOTAL_CLAMP - att
            d_im = jnp.clip((keff * d) * w_over_c, -att_left, att_left)
            att = att + jnp.abs(d_im)

            ep = jnp.exp(d_im); em = jnp.exp(-d_im)
            ch = 0.5 * (ep + em); sh = 0.5 * (ep - em)
            cw = jnp.cos(d_re); sw = jnp.sin(d_re)

            c_re = cw * ch; c_im = -sw * sh                    # cos(delta)
            s_re = sw * ch; s_im = cw * sh                     # sin(delta)

            inv_nk2 = 1.0 / (n * n + keff * keff)              # (TB, 1)
            inv_n_re = n * inv_nk2; inv_n_im = -keff * inv_nk2

            b_re = -s_im * inv_n_re - s_re * inv_n_im          # (i sin d)/n_tilde
            b_im = -s_im * inv_n_im + s_re * inv_n_re
            g_re = -s_im * n - s_re * keff                     # i n_tilde sin d
            g_im = -s_im * keff + s_re * n

            A = [[(c_re, c_im), (b_re, b_im)],
                 [(g_re, g_im), (c_re, c_im)]]
            if M is None:
                M = A                                          # first layer: M = A
            else:
                newM = [[None, None], [None, None]]
                for i in range(2):
                    for j in range(2):
                        acc_re = None; acc_im = None
                        for t in range(2):
                            m_re, m_im = M[i][t]
                            a_re, a_im = A[t][j]
                            pr = m_re * a_re - m_im * a_im
                            pi = m_re * a_im + m_im * a_re
                            acc_re = pr if acc_re is None else acc_re + pr
                            acc_im = pi if acc_im is None else acc_im + pi
                        newM[i][j] = (acc_re, acc_im)
                M = newM

        # air on both sides: t = 2 / (M00 + M01 + M10 + M11)
        den_re = M[0][0][0] + M[0][1][0] + M[1][0][0] + M[1][1][0]
        den_im = M[0][0][1] + M[0][1][1] + M[1][0][1] + M[1][1][1]
        inv_den2 = pl.reciprocal(den_re * den_re + den_im * den_im, approx=False)
        t_re = 2.0 * den_re * inv_den2
        t_im = -2.0 * den_im * inv_den2

        phi = d_total * w_over_c                    # normalise vs air path
        p_re = jnp.cos(phi); p_im = jnp.sin(phi)
        h_re = t_re * p_re - t_im * p_im
        h_im = t_re * p_im + t_im * p_re

        xre = xre_ref[:, lo:hi]; xim = xim_ref[:, lo:hi]       # (1,F), implicit bcast
        spec_ref[:, lo:hi] = h_re * xre - h_im * xim
        spec_ref[:, Kp + lo:Kp + hi] = h_re * xim + h_im * xre


def _idft_matmul_kernel(spec_ref,   # VMEM (TBm, 2Kp) f32 : packed spectrum
                        w_ref,      # VMEM (2Kp, tn)      : real-IDFT panel [cos;-sin]
                        noise_ref,  # VMEM (1|TBm, tn)    : additive noise
                        y_ref):     # VMEM (TBm, tn)      : simulated pulse panel (out)
    y = jnp.dot(spec_ref[...].astype(w_ref.dtype), w_ref[...],
                preferred_element_type=jnp.float32)
    y_ref[...] = y + noise_ref[...]


def make_layered_simulator(reference_pulse, deltat, *, matmul_dtype=jnp.bfloat16):
    """Precomputes everything layer-independent once and returns
    simulate(layers_nkd, noise) -> (B, N) simulated pulses.

    layers_nkd : (L, 3) or (B, L, 3) rows of (n, k, D)
    noise      : (N,) shared noise or (B, N) per-candidate noise (already scaled)
    """
    x_np = np.asarray(jax.device_get(reference_pulse), dtype=np.float64)
    N = int(x_np.shape[0])
    K = N // 2 + 1
    Kp = max(128, ((K + 127) // 128) * 128)              # lane-aligned freq count

    # ---- one-time host-side setup (numpy, cached in the closure) -----------
    kk = np.arange(K, dtype=np.float64)
    nn = np.arange(N, dtype=np.float64)

    ang_f = -2.0 * np.pi * np.outer(kk, nn) / N          # forward rfft of reference
    Xre = np.cos(ang_f) @ x_np
    Xim = np.sin(ang_f) @ x_np
    xre = np.zeros((1, Kp), np.float32); xre[0, :K] = Xre
    xim = np.zeros((1, Kp), np.float32); xim[0, :K] = Xim

    omega = np.zeros((1, Kp), np.float32)
    omega[0, :K] = 2.0 * np.pi * kk / (N * deltat)

    scale = np.zeros((Kp,), np.float64)                  # rfft-style IDFT weights
    scale[:K] = 2.0
    scale[0] = 1.0
    if N % 2 == 0:
        scale[N // 2] = 1.0
    kp = np.arange(Kp, dtype=np.float64)
    ang_i = 2.0 * np.pi * np.outer(kp, nn) / N
    W = np.concatenate([(scale[:, None] * np.cos(ang_i)) / N,
                        (-scale[:, None] * np.sin(ang_i)) / N], axis=0)  # (2Kp, N)

    xre_d, xim_d, omega_d = jnp.asarray(xre), jnp.asarray(xim), jnp.asarray(omega)
    w_d = jnp.asarray(W, dtype=matmul_dtype)
    wbytes = jnp.dtype(matmul_dtype).itemsize

    # ---- VMEM budget (v7x: only 64 MiB physical per TensorCore) ------------
    try:
        vmem_cap = int(pltpu.get_tpu_info().vmem_capacity_bytes)
    except Exception:
        vmem_cap = 64 * 2**20
    budget = int(0.7 * vmem_cap)

    def _choose_tiles(B):
        # MXU-row-sized batch tile for the IDFT matmul (capped at 256 = v6e/v7x rows)
        tb = 1 << int(np.ceil(np.log2(((B + 7) // 8) * 8)))
        tb = max(8, min(256, tb))
        b_pad = ((B + tb - 1) // tb) * tb
        if N % 128 != 0:
            return tb, b_pad, N
        cands = [c for c in range(N, 127, -128) if N % c == 0]
        # with a single batch tile, prefer >=2 time panels so both v7x cores get work
        if b_pad == tb and N >= 256 and len(cands) > 1:
            cands = cands[1:] + cands[:1]
        tn = min(cands)
        for c in cands:
            need = (2 * (2 * Kp) * c * wbytes        # W panel, double-buffered
                    + 2 * tb * (2 * Kp) * 4          # spectrum block (f32)
                    + 4 * tb * c * 4                 # output + noise blocks
                    + (2 << 20))                     # headroom
            if need <= budget:
                tn = c
                break
        return tb, b_pad, tn

    def _simulate(layers_nkd, noise):
        layers_nkd = jnp.asarray(layers_nkd, jnp.float32)
        if layers_nkd.ndim == 2:
            layers_nkd = layers_nkd[None]
        B, L, _ = layers_nkd.shape
        tb_mm, b_pad, tn = _choose_tiles(B)

        params = layers_nkd.reshape(B, 3 * L)
        # edge-replicate padded rows (avoids 1/0 in unused candidate rows)
        params = jnp.pad(params, ((0, b_pad - B), (0, 0)), mode="edge")

        noise = jnp.asarray(noise, jnp.float32)
        shared_noise = noise.ndim == 1
        noise_arr = (noise.reshape(1, N) if shared_noise
                     else jnp.pad(noise, ((0, b_pad - B), (0, 0))))

        # ---- stage 1: TMM spectrum, computed once per 8-candidate tile -----
        spec = pl.pallas_call(
            _spectrum_kernel,
            out_shape=jax.ShapeDtypeStruct((b_pad, 2 * Kp), jnp.float32),
            grid_spec=pltpu.PrefetchScalarGridSpec(
                num_scalar_prefetch=0,
                grid=(b_pad // _TB_SPEC,),
                in_specs=[
                    pl.BlockSpec((_TB_SPEC, 3 * L), lambda bt: (bt, 0)),
                    pl.BlockSpec((1, Kp), lambda bt: (0, 0)),
                    pl.BlockSpec((1, Kp), lambda bt: (0, 0)),
                    pl.BlockSpec((1, Kp), lambda bt: (0, 0)),
                ],
                out_specs=pl.BlockSpec((_TB_SPEC, 2 * Kp), lambda bt: (bt, 0)),
            ),
            compiler_params=pltpu.CompilerParams(
                dimension_semantics=("parallel",),
                vmem_limit_bytes=budget),
        )(params, xre_d, xim_d, omega_d)

        # ---- stage 2: fused real-IDFT MXU matmul + noise --------------------
        # time-panel axis OUTER -> each W panel is DMA'd exactly once; both axes
        # independent ("parallel") so v7x can shard panels/batch tiles over 2 TCs.
        if shared_noise:
            noise_spec = pl.BlockSpec((1, tn), lambda tp, bt: (0, tp))
        else:
            noise_spec = pl.BlockSpec((tb_mm, tn), lambda tp, bt: (bt, tp))

        y = pl.pallas_call(
            _idft_matmul_kernel,
            out_shape=jax.ShapeDtypeStruct((b_pad, N), jnp.float32),
            grid_spec=pltpu.PrefetchScalarGridSpec(
                num_scalar_prefetch=0,
                grid=(N // tn, b_pad // tb_mm),
                in_specs=[
                    pl.BlockSpec((tb_mm, 2 * Kp), lambda tp, bt: (bt, 0)),
                    pl.BlockSpec((2 * Kp, tn), lambda tp, bt: (0, tp)),
                    noise_spec,
                ],
                out_specs=pl.BlockSpec((tb_mm, tn), lambda tp, bt: (bt, tp)),
            ),
            compiler_params=pltpu.CompilerParams(
                dimension_semantics=("parallel", "parallel"),
                vmem_limit_bytes=budget),
        )(spec, w_d, noise_arr)
        return y[:B]

    return jax.jit(_simulate)


def make_layered_extractor(reference_pulse, deltat, *, noise_level=0.002,
                           matmul_dtype=jnp.bfloat16):
    """Mirrors LayeredExtractorD.forward(): reference_pulse/deltat fixed at
    construction (all layer-independent setup cached); forward() varies only
    the layer parameters (n, k, log_D)."""
    simulate = make_layered_simulator(reference_pulse, deltat,
                                      matmul_dtype=matmul_dtype)
    amp = float(jnp.max(jnp.abs(reference_pulse)))
    N = int(reference_pulse.shape[0])

    def forward(n_values, k_values, log_D_params, noise_key):
        d_values = jnp.exp(jnp.asarray(log_D_params, jnp.float32))   # D = exp(log_D)
        layers_nkd = jnp.stack([jnp.asarray(n_values, jnp.float32),
                                jnp.asarray(k_values, jnp.float32),
                                d_values], axis=-1)                  # (L, 3)
        noise = noise_level * amp * jax.random.normal(noise_key, (N,), jnp.float32)
        y_sim = simulate(layers_nkd, noise)[0]
        return y_sim[:N]                                             # truncate (no-op)

    forward.simulate = simulate
    return forward


def gen_loss_function(y_simulated, y_exp, alpha):
    # plain-JAX glue (matches the PyTorch gen_loss_function); tiny reduction
    return alpha * jnp.sqrt(jnp.mean((y_simulated - y_exp) ** 2))


if __name__ == "__main__":
    N = 256                      # reference pulse length
    deltat = 0.05e-12            # 50 fs sampling

    # deterministic synthetic THz reference pulse (derivative of a Gaussian)
    t = jnp.arange(N, dtype=jnp.float32) * deltat
    t0, sigma = 2.0e-12, 0.3e-12
    reference_pulse = (-(t - t0) / sigma) * jnp.exp(-((t - t0) ** 2) / (2.0 * sigma ** 2))
    reference_pulse = reference_pulse.astype(jnp.float32)

    key = jax.random.PRNGKey(0)
    noise_key, exp_key = jax.random.split(key)

    # layers_init equivalent: [(n + i*k, D), ...]; parameters stored as log(D)
    layers_init = [(1.95 + 0.02j, 120e-6), (2.60 + 0.05j, 80e-6)]
    n_values = [float(np.real(layer[0])) for layer in layers_init]
    k_values = [float(np.imag(layer[0])) for layer in layers_init]
    log_D_params = [float(np.log(layer[1])) for layer in layers_init]

    # "experimental" pulse stand-in (deterministic)
    experimental_pulse = reference_pulse + 0.01 * jax.random.normal(
        exp_key, (N,), dtype=jnp.float32)

    forward = make_layered_extractor(reference_pulse, deltat, noise_level=0.002)
    y_simulated = jax.block_until_ready(
        forward(n_values, k_values, log_D_params, noise_key))
    loss = jax.block_until_ready(
        gen_loss_function(y_simulated, experimental_pulse, alpha=1.0))

    # ---- validation: noise-free kernel output vs float64 numpy TMM reference ----
    layers_nkd = np.stack([np.asarray(n_values), np.asarray(k_values),
                           np.exp(np.asarray(log_D_params))], axis=-1).astype(np.float32)
    y_clean = np.asarray(jax.block_until_ready(
        forward.simulate(layers_nkd, np.zeros((N,), np.float32))))[0]

    x64 = np.asarray(reference_pulse, dtype=np.float64)
    X = np.fft.rfft(x64)
    w = 2.0 * np.pi * np.fft.rfftfreq(N, d=deltat)
    M00 = np.ones_like(X); M01 = np.zeros_like(X)
    M10 = np.zeros_like(X); M11 = np.ones_like(X)
    d_tot = 0.0
    for (nc, D) in layers_init:
        n_c = np.conj(nc)                  # n - i k (matches the kernel convention)
        delta = n_c * w * D / C0
        cd, sd = np.cos(delta), np.sin(delta)
        A00, A01, A10, A11 = cd, 1j * sd / n_c, 1j * n_c * sd, cd
        M00, M01, M10, M11 = (M00 * A00 + M01 * A10, M00 * A01 + M01 * A11,
                              M10 * A00 + M11 * A10, M10 * A01 + M11 * A11)
        d_tot += float(D)
    H = (2.0 / (M00 + M01 + M10 + M11)) * np.exp(1j * w * d_tot / C0)
    y_ref64 = np.fft.irfft(H * X, n=N)
    err = float(np.max(np.abs(y_clean.astype(np.float64) - y_ref64)))

    assert y_simulated.shape == (N,)
    assert bool(jnp.all(jnp.isfinite(y_simulated)))
    assert bool(jnp.isfinite(loss))
    assert err < 5e-2, f"kernel vs float64 TMM reference mismatch: {err}"
    print("KERNEL_OK")
</pallas_src>

<mosaic_0001>
module attributes {stable_mosaic.version = 11 : i64} {
  func.func @_idft_matmul_kernel(%arg0: i32, %arg1: i32, %arg2: memref<8x512xf32, #tpu.memory_space<vmem>>, %arg3: memref<512x128xbf16, #tpu.memory_space<vmem>>, %arg4: memref<1x128xf32, #tpu.memory_space<vmem>>, %arg5: memref<8x128xf32, #tpu.memory_space<vmem>>) attributes {dimension_semantics = [#tpu.dimension_semantics<parallel>, #tpu.dimension_semantics<parallel>], iteration_bounds = array<i64: 2, 1>, scalar_prefetch = 0 : i64, scratch_operands = 0 : i64, tpu.core_type = #tpu.core_type<tc>, window_params = [{transform_indices = @transform_0, window_bounds = array<i64: 8, 512>}, {transform_indices = @transform_1, window_bounds = array<i64: 512, 128>}, {transform_indices = @transform_2, window_bounds = array<i64: 1, 128>}, {transform_indices = @transform_3, window_bounds = array<i64: 8, 128>}]} {
    %c0 = arith.constant 0 : index
    %c0_0 = arith.constant 0 : index
    %0 = vector.load %arg2[%c0, %c0_0] : memref<8x512xf32, #tpu.memory_space<vmem>>, vector<8x512xf32>
    %1 = arith.truncf %0 : vector<8x512xf32> to vector<8x512xbf16>
    %c0_1 = arith.constant 0 : index
    %c0_2 = arith.constant 0 : index
    %2 = vector.load %arg3[%c0_1, %c0_2] : memref<512x128xbf16, #tpu.memory_space<vmem>>, vector<512x128xbf16>
    %cst = arith.constant dense<0.000000e+00> : vector<8x128xf32>
    %3 = tpu.matmul %1, %2, %cst {dimension_numbers = #tpu.dot_dimension_numbers<[1], [0], [0], [1], [0, 0, 1, 1], [], []>} : vector<8x512xbf16>, vector<512x128xbf16>, vector<8x128xf32> -> vector<8x128xf32>
    %c0_3 = arith.constant 0 : index
    %c0_4 = arith.constant 0 : index
    %4 = vector.load %arg4[%c0_3, %c0_4] : memref<1x128xf32, #tpu.memory_space<vmem>>, vector<1x128xf32>
    %5 = vector.broadcast %4 : vector<1x128xf32> to vector<8x128xf32>
    %6 = arith.addf %3, %5 : vector<8x128xf32>
    %c0_5 = arith.constant 0 : index
    %c0_6 = arith.constant 0 : index
    %7 = vector.load %arg5[%c0_5, %c0_6] : memref<8x128xf32, #tpu.memory_space<vmem>>, vector<8x128xf32>
    tpu.vector_store %arg5[%c0_5, %c0_6], %6 {strides = array<i32>} : memref<8x128xf32, #tpu.memory_space<vmem>>, vector<8x128xf32>,
    return
  }
  func.func @transform_0(%arg0: i32, %arg1: i32) -> (i32, i32) {
    %c0_i32 = arith.constant 0 : i32
    %c0_i32_0 = arith.constant 0 : i32
    return %arg1, %c0_i32 : i32, i32
  }
  func.func @transform_1(%arg0: i32, %arg1: i32) -> (i32, i32) {
    %c0_i32 = arith.constant 0 : i32
    %c0_i32_0 = arith.constant 0 : i32
    return %c0_i32, %arg0 : i32, i32
  }
  func.func @transform_2(%arg0: i32, %arg1: i32) -> (i32, i32) {
    %c0_i32 = arith.constant 0 : i32
    %c0_i32_0 = arith.constant 0 : i32
    return %c0_i32, %arg0 : i32, i32
  }
  func.func @transform_3(%arg0: i32, %arg1: i32) -> (i32, i32) {
    %c0_i32 = arith.constant 0 : i32
    return %arg1, %arg0 : i32, i32
  }
}

module attributes {stable_mosaic.version = 11 : i64} {
  func.func @_spectrum_kernel(%arg0: i32, %arg1: memref<8x6xf32, #tpu.memory_space<vmem>>, %arg2: memref<1x256xf32, #tpu.memory_space<vmem>>, %arg3: memref<1x256xf32, #tpu.memory_space<vmem>>, %arg4: memref<1x256xf32, #tpu.memory_space<vmem>>, %arg5: memref<8x512xf32, #tpu.memory_space<vmem>>) attributes {dimension_semantics = [#tpu.dimension_semantics<parallel>], iteration_bounds = array<i64: 1>, scalar_prefetch = 0 : i64, scratch_operands = 0 : i64, tpu.core_type = #tpu.core_type<tc>, window_params = [{transform_indices = @transform_0, window_bounds = array<i64: 8, 6>}, {pipeline_mode = #tpu.pipeline_mode<synchronous>, transform_indices = @transform_1, window_bounds = array<i64: 1, 256>}, {pipeline_mode = #tpu.pipeline_mode<synchronous>, transform_indices = @transform_2, window_bounds = array<i64: 1, 256>}, {pipeline_mode = #tpu.pipeline_mode<synchronous>, transform_indices = @transform_3, window_bounds = array<i64: 1, 256>}, {transform_indices = @transform_4, window_bounds = array<i64: 8, 512>}]} {
    %c0 = arith.constant 0 : index
    %c0_0 = arith.constant 0 : index
    %0 = vector.load %arg1[%c0, %c0_0] : memref<8x6xf32, #tpu.memory_space<vmem>>, vector<8x6xf32>
    %c0_1 = arith.constant 0 : index
    %c0_2 = arith.constant 0 : index
    %1 = vector.load %arg4[%c0_1, %c0_2] : memref<1x256xf32, #tpu.memory_space<vmem>>, vector<1x256xf32>
    %cst = arith.constant 3.33564087E-9 : f32
    %2 = vector.broadcast %cst : f32 to vector<1x256xf32>
    %3 = arith.mulf %1, %2 : vector<1x256xf32>
    %cst_3 = arith.constant 0.000000e+00 : f32
    %4 = vector.broadcast %cst_3 : f32 to vector<8x256xf32>
    %5 = vector.extract_strided_slice %0 {offsets = [0, 0], sizes = [8, 1], strides = [1, 1]} : vector<8x6xf32> to vector<8x1xf32>
    %6 = vector.extract_strided_slice %0 {offsets = [0, 1], sizes = [8, 1], strides = [1, 1]} : vector<8x6xf32> to vector<8x1xf32>
    %7 = vector.extract_strided_slice %0 {offsets = [0, 2], sizes = [8, 1], strides = [1, 1]} : vector<8x6xf32> to vector<8x1xf32>
    %cst_4 = arith.constant 0.000000e+00 : f32
    %8 = vector.broadcast %cst_4 : f32 to vector<8x1xf32>
    %9 = arith.subf %8, %6 : vector<8x1xf32>
    %10 = arith.mulf %5, %7 : vector<8x1xf32>
    %11 = vector.broadcast %10 : vector<8x1xf32> to vector<8x256xf32>
    %12 = vector.broadcast %3 : vector<1x256xf32> to vector<8x256xf32>
    %13 = arith.mulf %11, %12 : vector<8x256xf32>
    %cst_5 = arith.constant 3.000000e+01 : f32
    %14 = vector.broadcast %cst_5 : f32 to vector<8x256xf32>
    %15 = arith.subf %14, %4 : vector<8x256xf32>
    %16 = arith.mulf %9, %7 : vector<8x1xf32>
    %17 = vector.broadcast %16 : vector<8x1xf32> to vector<8x256xf32>
    %18 = vector.broadcast %3 : vector<1x256xf32> to vector<8x256xf32>
    %19 = arith.mulf %17, %18 : vector<8x256xf32>
    %cst_6 = arith.constant 0.000000e+00 : f32
    %20 = vector.broadcast %cst_6 : f32 to vector<8x256xf32>
    %21 = arith.subf %20, %15 : vector<8x256xf32>
    %22 = arith.maximumf %21, %19 : vector<8x256xf32>
    %23 = arith.minimumf %15, %22 : vector<8x256xf32>
    %24 = math.absf %23 : vector<8x256xf32>
    %25 = arith.addf %4, %24 : vector<8x256xf32>
    %26 = math.exp %23 : vector<8x256xf32>
    %cst_7 = arith.constant 0.000000e+00 : f32
    %27 = vector.broadcast %cst_7 : f32 to vector<8x256xf32>
    %28 = arith.subf %27, %23 : vector<8x256xf32>
    %29 = math.exp %28 : vector<8x256xf32>
    %30 = arith.addf %26, %29 : vector<8x256xf32>
    %cst_8 = arith.constant 5.000000e-01 : f32
    %31 = vector.broadcast %cst_8 : f32 to vector<8x256xf32>
    %32 = arith.mulf %31, %30 : vector<8x256xf32>
    %33 = arith.subf %26, %29 : vector<8x256xf32>
    %cst_9 = arith.constant 5.000000e-01 : f32
    %34 = vector.broadcast %cst_9 : f32 to vector<8x256xf32>
    %35 = arith.mulf %34, %33 : vector<8x256xf32>
    %36 = math.cos %13 : vector<8x256xf32>
    %37 = math.sin %13 : vector<8x256xf32>
    %38 = arith.mulf %36, %32 : vector<8x256xf32>
    %cst_10 = arith.constant 0.000000e+00 : f32
    %39 = vector.broadcast %cst_10 : f32 to vector<8x256xf32>
    %40 = arith.subf %39, %37 : vector<8x256xf32>
    %41 = arith.mulf %40, %35 : vector<8x256xf32>
    %42 = arith.mulf %37, %32 : vector<8x256xf32>
    %43 = arith.mulf %36, %35 : vector<8x256xf32>
    %44 = arith.mulf %5, %5 : vector<8x1xf32>
    %45 = arith.mulf %9, %9 : vector<8x1xf32>
    %46 = arith.addf %44, %45 : vector<8x1xf32>
    %cst_11 = arith.constant 1.000000e+00 : f32
    %47 = vector.broadcast %cst_11 : f32 to vector<8x1xf32>
    %48 = arith.divf %47, %46 : vector<8x1xf32>
    %49 = arith.mulf %5, %48 : vector<8x1xf32>
    %cst_12 = arith.constant 0.000000e+00 : f32
    %50 = vector.broadcast %cst_12 : f32 to vector<8x1xf32>
    %51 = arith.subf %50, %9 : vector<8x1xf32>
    %52 = arith.mulf %51, %48 : vector<8x1xf32>
    %cst_13 = arith.constant 0.000000e+00 : f32
    %53 = vector.broadcast %cst_13 : f32 to vector<8x256xf32>
    %54 = arith.subf %53, %43 : vector<8x256xf32>
    %55 = vector.broadcast %49 : vector<8x1xf32> to vector<8x256xf32>
    %56 = arith.mulf %54, %55 : vector<8x256xf32>
    %57 = vector.broadcast %52 : vector<8x1xf32> to vector<8x256xf32>
    %58 = arith.mulf %42, %57 : vector<8x256xf32>
    %59 = arith.subf %56, %58 : vector<8x256xf32>
    %cst_14 = arith.constant 0.000000e+00 : f32
    %60 = vector.broadcast %cst_14 : f32 to vector<8x256xf32>
    %61 = arith.subf %60, %43 : vector<8x256xf32>
    %62 = vector.broadcast %52 : vector<8x1xf32> to vector<8x256xf32>
    %63 = arith.mulf %61, %62 : vector<8x256xf32>
    %64 = vector.broadcast %49 : vector<8x1xf32> to vector<8x256xf32>
    %65 = arith.mulf %42, %64 : vector<8x256xf32>
    %66 = arith.addf %63, %65 : vector<8x256xf32>
    %cst_15 = arith.constant 0.000000e+00 : f32
    %67 = vector.broadcast %cst_15 : f32 to vector<8x256xf32>
    %68 = arith.subf %67, %43 : vector<8x256xf32>
    %69 = vector.broadcast %5 : vector<8x1xf32> to vector<8x256xf32>
    %70 = arith.mulf %68, %69 : vector<8x256xf32>
    %71 = vector.broadcast %9 : vector<8x1xf32> to vector<8x256xf32>
    %72 = arith.mulf %42, %71 : vector<8x256xf32>
    %73 = arith.subf %70, %72 : vector<8x256xf32>
    %cst_16 = arith.constant 0.000000e+00 : f32
    %74 = vector.broadcast %cst_16 : f32 to vector<8x256xf32>
    %75 = arith.subf %74, %43 : vector<8x256xf32>
    %76 = vector.broadcast %9 : vector<8x1xf32> to vector<8x256xf32>
    %77 = arith.mulf %75, %76 : vector<8x256xf32>
    %78 = vector.broadcast %5 : vector<8x1xf32> to vector<8x256xf32>
    %79 = arith.mulf %42, %78 : vector<8x256xf32>
    %80 = arith.addf %77, %79 : vector<8x256xf32>
    %81 = vector.extract_strided_slice %0 {offsets = [0, 3], sizes = [8, 1], strides = [1, 1]} : vector<8x6xf32> to vector<8x1xf32>
    %82 = vector.extract_strided_slice %0 {offsets = [0, 4], sizes = [8, 1], strides = [1, 1]} : vector<8x6xf32> to vector<8x1xf32>
    %83 = vector.extract_strided_slice %0 {offsets = [0, 5], sizes = [8, 1], strides = [1, 1]} : vector<8x6xf32> to vector<8x1xf32>
    %84 = arith.addf %7, %83 : vector<8x1xf32>
    %cst_17 = arith.constant 0.000000e+00 : f32
    %85 = vector.broadcast %cst_17 : f32 to vector<8x1xf32>
    %86 = arith.subf %85, %82 : vector<8x1xf32>
    %87 = arith.mulf %81, %83 : vector<8x1xf32>
    %88 = vector.broadcast %87 : vector<8x1xf32> to vector<8x256xf32>
    %89 = vector.broadcast %3 : vector<1x256xf32> to vector<8x256xf32>
    %90 = arith.mulf %88, %89 : vector<8x256xf32>
    %cst_18 = arith.constant 3.000000e+01 : f32
    %91 = vector.broadcast %cst_18 : f32 to vector<8x256xf32>
    %92 = arith.subf %91, %25 : vector<8x256xf32>
    %93 = arith.mulf %86, %83 : vector<8x1xf32>
    %94 = vector.broadcast %93 : vector<8x1xf32> to vector<8x256xf32>
    %95 = vector.broadcast %3 : vector<1x256xf32> to vector<8x256xf32>
    %96 = arith.mulf %94, %95 : vector<8x256xf32>
    %cst_19 = arith.constant 0.000000e+00 : f32
    %97 = vector.broadcast %cst_19 : f32 to vector<8x256xf32>
    %98 = arith.subf %97, %92 : vector<8x256xf32>
    %99 = arith.maximumf %98, %96 : vector<8x256xf32>
    %100 = arith.minimumf %92, %99 : vector<8x256xf32>
    %101 = math.exp %100 : vector<8x256xf32>
    %cst_20 = arith.constant 0.000000e+00 : f32
    %102 = vector.broadcast %cst_20 : f32 to vector<8x256xf32>
    %103 = arith.subf %102, %100 : vector<8x256xf32>
    %104 = math.exp %103 : vector<8x256xf32>
    %105 = arith.addf %101, %104 : vector<8x256xf32>
    %cst_21 = arith.constant 5.000000e-01 : f32
    %106 = vector.broadcast %cst_21 : f32 to vector<8x256xf32>
    %107 = arith.mulf %106, %105 : vector<8x256xf32>
    %108 = arith.subf %101, %104 : vector<8x256xf32>
    %cst_22 = arith.constant 5.000000e-01 : f32
    %109 = vector.broadcast %cst_22 : f32 to vector<8x256xf32>
    %110 = arith.mulf %109, %108 : vector<8x256xf32>
    %111 = math.cos %90 : vector<8x256xf32>
    %112 = math.sin %90 : vector<8x256xf32>
    %113 = arith.mulf %111, %107 : vector<8x256xf32>
    %cst_23 = arith.constant 0.000000e+00 : f32
    %114 = vector.broadcast %cst_23 : f32 to vector<8x256xf32>
    %115 = arith.subf %114, %112 : vector<8x256xf32>
    %116 = arith.mulf %115, %110 : vector<8x256xf32>
    %117 = arith.mulf %112, %107 : vector<8x256xf32>
    %118 = arith.mulf %111, %110 : vector<8x256xf32>
    %119 = arith.mulf %81, %81 : vector<8x1xf32>
    %120 = arith.mulf %86, %86 : vector<8x1xf32>
    %121 = arith.addf %119, %120 : vector<8x1xf32>
    %cst_24 = arith.constant 1.000000e+00 : f32
    %122 = vector.broadcast %cst_24 : f32 to vector<8x1xf32>
    %123 = arith.divf %122, %121 : vector<8x1xf32>
    %124 = arith.mulf %81, %123 : vector<8x1xf32>
    %cst_25 = arith.constant 0.000000e+00 : f32
    %125 = vector.broadcast %cst_25 : f32 to vector<8x1xf32>
    %126 = arith.subf %125, %86 : vector<8x1xf32>
    %127 = arith.mulf %126, %123 : vector<8x1xf32>
    %cst_26 = arith.constant 0.000000e+00 : f32
    %128 = vector.broadcast %cst_26 : f32 to vector<8x256xf32>
    %129 = arith.subf %128, %118 : vector<8x256xf32>
    %130 = vector.broadcast %124 : vector<8x1xf32> to vector<8x256xf32>
    %131 = arith.mulf %129, %130 : vector<8x256xf32>
    %132 = vector.broadcast %127 : vector<8x1xf32> to vector<8x256xf32>
    %133 = arith.mulf %117, %132 : vector<8x256xf32>
    %134 = arith.subf %131, %133 : vector<8x256xf32>
    %cst_27 = arith.constant 0.000000e+00 : f32
    %135 = vector.broadcast %cst_27 : f32 to vector<8x256xf32>
    %136 = arith.subf %135, %118 : vector<8x256xf32>
    %137 = vector.broadcast %127 : vector<8x1xf32> to vector<8x256xf32>
    %138 = arith.mulf %136, %137 : vector<8x256xf32>
    %139 = vector.broadcast %124 : vector<8x1xf32> to vector<8x256xf32>
    %140 = arith.mulf %117, %139 : vector<8x256xf32>
    %141 = arith.addf %138, %140 : vector<8x256xf32>
    %cst_28 = arith.constant 0.000000e+00 : f32
    %142 = vector.broadcast %cst_28 : f32 to vector<8x256xf32>
    %143 = arith.subf %142, %118 : vector<8x256xf32>
    %144 = vector.broadcast %81 : vector<8x1xf32> to vector<8x256xf32>
    %145 = arith.mulf %143, %144 : vector<8x256xf32>
    %146 = vector.broadcast %86 : vector<8x1xf32> to vector<8x256xf32>
    %147 = arith.mulf %117, %146 : vector<8x256xf32>
    %148 = arith.subf %145, %147 : vector<8x256xf32>
    %cst_29 = arith.constant 0.000000e+00 : f32
    %149 = vector.broadcast %cst_29 : f32 to vector<8x256xf32>
    %150 = arith.subf %149, %118 : vector<8x256xf32>
    %151 = vector.broadcast %86 : vector<8x1xf32> to vector<8x256xf32>
    %152 = arith.mulf %150, %151 : vector<8x256xf32>
    %153 = vector.broadcast %81 : vector<8x1xf32> to vector<8x256xf32>
    %154 = arith.mulf %117, %153 : vector<8x256xf32>
    %155 = arith.addf %152, %154 : vector<8x256xf32>
    %156 = arith.mulf %38, %113 : vector<8x256xf32>
    %157 = arith.mulf %41, %116 : vector<8x256xf32>
    %158 = arith.subf %156, %157 : vector<8x256xf32>
    %159 = arith.mulf %38, %116 : vector<8x256xf32>
    %160 = arith.mulf %41, %113 : vector<8x256xf32>
    %161 = arith.addf %159, %160 : vector<8x256xf32>
    %162 = arith.mulf %59, %148 : vector<8x256xf32>
    %163 = arith.mulf %66, %155 : vector<8x256xf32>
    %164 = arith.subf %162, %163 : vector<8x256xf32>
    %165 = arith.mulf %59, %155 : vector<8x256xf32>
    %166 = arith.mulf %66, %148 : vector<8x256xf32>
    %167 = arith.addf %165, %166 : vector<8x256xf32>
    %168 = arith.addf %158, %164 : vector<8x256xf32>
    %169 = arith.addf %161, %167 : vector<8x256xf32>
    %170 = arith.mulf %38, %134 : vector<8x256xf32>
    %171 = arith.mulf %41, %141 : vector<8x256xf32>
    %172 = arith.subf %170, %171 : vector<8x256xf32>
    %173 = arith.mulf %38, %141 : vector<8x256xf32>
    %174 = arith.mulf %41, %134 : vector<8x256xf32>
    %175 = arith.addf %173, %174 : vector<8x256xf32>
    %176 = arith.mulf %59, %113 : vector<8x256xf32>
    %177 = arith.mulf %66, %116 : vector<8x256xf32>
    %178 = arith.subf %176, %177 : vector<8x256xf32>
    %179 = arith.mulf %59, %116 : vector<8x256xf32>
    %180 = arith.mulf %66, %113 : vector<8x256xf32>
    %181 = arith.addf %179, %180 : vector<8x256xf32>
    %182 = arith.addf %172, %178 : vector<8x256xf32>
    %183 = arith.addf %175, %181 : vector<8x256xf32>
    %184 = arith.mulf %73, %113 : vector<8x256xf32>
    %185 = arith.mulf %80, %116 : vector<8x256xf32>
    %186 = arith.subf %184, %185 : vector<8x256xf32>
    %187 = arith.mulf %73, %116 : vector<8x256xf32>
    %188 = arith.mulf %80, %113 : vector<8x256xf32>
    %189 = arith.addf %187, %188 : vector<8x256xf32>
    %190 = arith.mulf %38, %148 : vector<8x256xf32>
    %191 = arith.mulf %41, %155 : vector<8x256xf32>
    %192 = arith.subf %190, %191 : vector<8x256xf32>
    %193 = arith.mulf %38, %155 : vector<8x256xf32>
    %194 = arith.mulf %41, %148 : vector<8x256xf32>
    %195 = arith.addf %193, %194 : vector<8x256xf32>
    %196 = arith.addf %186, %192 : vector<8x256xf32>
    %197 = arith.addf %189, %195 : vector<8x256xf32>
    %198 = arith.mulf %73, %134 : vector<8x256xf32>
    %199 = arith.mulf %80, %141 : vector<8x256xf32>
    %200 = arith.subf %198, %199 : vector<8x256xf32>
    %201 = arith.mulf %73, %141 : vector<8x256xf32>
    %202 = arith.mulf %80, %134 : vector<8x256xf32>
    %203 = arith.addf %201, %202 : vector<8x256xf32>
    %204 = arith.mulf %38, %113 : vector<8x256xf32>
    %205 = arith.mulf %41, %116 : vector<8x256xf32>
    %206 = arith.subf %204, %205 : vector<8x256xf32>
    %207 = arith.mulf %38, %116 : vector<8x256xf32>
    %208 = arith.mulf %41, %113 : vector<8x256xf32>
    %209 = arith.addf %207, %208 : vector<8x256xf32>
    %210 = arith.addf %200, %206 : vector<8x256xf32>
    %211 = arith.addf %203, %209 : vector<8x256xf32>
    %212 = arith.addf %168, %182 : vector<8x256xf32>
    %213 = arith.addf %212, %196 : vector<8x256xf32>
    %214 = arith.addf %213, %210 : vector<8x256xf32>
    %215 = arith.addf %169, %183 : vector<8x256xf32>
    %216 = arith.addf %215, %197 : vector<8x256xf32>
    %217 = arith.addf %216, %211 : vector<8x256xf32>
    %218 = arith.mulf %214, %214 : vector<8x256xf32>
    %219 = arith.mulf %217, %217 : vector<8x256xf32>
    %220 = arith.addf %218, %219 : vector<8x256xf32>
    %221 = tpu.reciprocal %220 : vector<8x256xf32> -> vector<8x256xf32>
    %cst_30 = arith.constant 2.000000e+00 : f32
    %222 = vector.broadcast %cst_30 : f32 to vector<8x256xf32>
    %223 = arith.mulf %222, %214 : vector<8x256xf32>
    %224 = arith.mulf %223, %221 : vector<8x256xf32>
    %cst_31 = arith.constant -2.000000e+00 : f32
    %225 = vector.broadcast %cst_31 : f32 to vector<8x256xf32>
    %226 = arith.mulf %225, %217 : vector<8x256xf32>
    %227 = arith.mulf %226, %221 : vector<8x256xf32>
    %228 = vector.broadcast %84 : vector<8x1xf32> to vector<8x256xf32>
    %229 = vector.broadcast %3 : vector<1x256xf32> to vector<8x256xf32>
    %230 = arith.mulf %228, %229 : vector<8x256xf32>
    %231 = math.cos %230 : vector<8x256xf32>
    %232 = math.sin %230 : vector<8x256xf32>
    %233 = arith.mulf %224, %231 : vector<8x256xf32>
    %234 = arith.mulf %227, %232 : vector<8x256xf32>
    %235 = arith.subf %233, %234 : vector<8x256xf32>
    %236 = arith.mulf %224, %232 : vector<8x256xf32>
    %237 = arith.mulf %227, %231 : vector<8x256xf32>
    %238 = arith.addf %236, %237 : vector<8x256xf32>
    %c0_32 = arith.constant 0 : index
    %c0_33 = arith.constant 0 : index
    %239 = vector.load %arg2[%c0_32, %c0_33] : memref<1x256xf32, #tpu.memory_space<vmem>>, vector<1x256xf32>
    %c0_34 = arith.constant 0 : index
    %c0_35 = arith.constant 0 : index
    %240 = vector.load %arg3[%c0_34, %c0_35] : memref<1x256xf32, #tpu.memory_space<vmem>>, vector<1x256xf32>
    %241 = vector.broadcast %239 : vector<1x256xf32> to vector<8x256xf32>
    %242 = arith.mulf %235, %241 : vector<8x256xf32>
    %243 = vector.broadcast %240 : vector<1x256xf32> to vector<8x256xf32>
    %244 = arith.mulf %238, %243 : vector<8x256xf32>
    %245 = arith.subf %242, %244 : vector<8x256xf32>
    %c0_36 = arith.constant 0 : index
    %c0_37 = arith.constant 0 : index
    %246 = vector.load %arg5[%c0_36, %c0_37] : memref<8x512xf32, #tpu.memory_space<vmem>>, vector<8x256xf32>
    tpu.vector_store %arg5[%c0_36, %c0_37], %245 {strides = array<i32>} : memref<8x512xf32, #tpu.memory_space<vmem>>, vector<8x256xf32>,
    %247 = vector.broadcast %240 : vector<1x256xf32> to vector<8x256xf32>
    %248 = arith.mulf %235, %247 : vector<8x256xf32>
    %249 = vector.broadcast %239 : vector<1x256xf32> to vector<8x256xf32>
    %250 = arith.mulf %238, %249 : vector<8x256xf32>
    %251 = arith.addf %248, %250 : vector<8x256xf32>
    %c0_38 = arith.constant 0 : index
    %c256 = arith.constant 256 : index
    %252 = vector.load %arg5[%c0_38, %c256] : memref<8x512xf32, #tpu.memory_space<vmem>>, vector<8x256xf32>
    tpu.vector_store %arg5[%c0_38, %c256], %251 {strides = array<i32>} : memref<8x512xf32, #tpu.memory_space<vmem>>, vector<8x256xf32>,
    return
  }
  func.func @transform_0(%arg0: i32) -> (i32, i32) {
    %c0_i32 = arith.constant 0 : i32
    %c0_i32_0 = arith.constant 0 : i32
    return %arg0, %c0_i32 : i32, i32
  }
  func.func @transform_1(%arg0: i32) -> (i32, i32) {
    %c0_i32 = arith.constant 0 : i32
    %c0_i32_0 = arith.constant 0 : i32
    %c0_i32_1 = arith.constant 0 : i32
    return %c0_i32, %c0_i32_0 : i32, i32
  }
  func.func @transform_2(%arg0: i32) -> (i32, i32) {
    %c0_i32 = arith.constant 0 : i32
    %c0_i32_0 = arith.constant 0 : i32
    %c0_i32_1 = arith.constant 0 : i32
    return %c0_i32, %c0_i32_0 : i32, i32
  }
  func.func @transform_3(%arg0: i32) -> (i32, i32) {
    %c0_i32 = arith.constant 0 : i32
    %c0_i32_0 = arith.constant 0 : i32
    %c0_i32_1 = arith.constant 0 : i32
    return %c0_i32, %c0_i32_0 : i32, i32
  }
  func.func @transform_4(%arg0: i32) -> (i32, i32) {
    %c0_i32 = arith.constant 0 : i32
    %c0_i32_0 = arith.constant 0 : i32
    return %arg0, %c0_i32 : i32, i32
  }
}

</mosaic_0001>

<bundles_post_ra>
// kernel: _simulate.3
= control target key start
LH: loop header
LB: loop body
LE: loop exit
PB: predicated region body
PF: predicated region fallthrough
CT: control target
= control target key end

     0   :  { %8 = vsyncpa [#allocation3], 0  ;;  %s1162_s0 = inlined_call_operand.vmem [shape: f32[8,512], index: 0, kind: input, shape index: {}]   ;;  %s1163_s1 = inlined_call_operand.hbm [shape: bf16[512,256], index: 1, kind: input, shape index: {}]   ;;  %s1164_s2 = inlined_call_operand.vmem [shape: f32[1,256], index: 2, kind: input, shape index: {}]   ;;  %s1165_s3 = inlined_call_operand.vmem [shape: f32[8,256], index: 3, kind: output, shape index: {}]  }
   0x1   :  { %10 = vsyncpa [#allocation3 + $0x1], 0  ;;  %s1016_s12 = smov 0   ;;  %s1018_s13 = smov 0  }
   0x2   :  { %s1020_s14 = smov 0   ;;  %s1022_s15 = smov 0  }
   0x3   :  { %s1024_s16 = smov 0   ;;  %s1026_s17 = smov 0  }
   0x4 LB: > { %s680_s18 = sadd.s32 4294967295, %s991_s17   ;;  %s28_s19 = sadd.s32 1, %s987_s16  ;;  %s991_s17 = sphi %s1026_s17, %s16_s17   ;;  %s987_s16 = sphi %s1024_s16, %s1172_s16   ;;  %s983_s15 = sphi %s1022_s15, %s1171_s15   ;;  %s979_s14 = sphi %s1020_s14, %s1170_s14   ;;  %s975_s13 = sphi %s1018_s13, %s1169_s13   ;;  %s971_s12 = sphi %s1016_s12, %s1168_s12  }
   0x5   : > { %p30_p0 = scmp.ge.s32.totalorder %s28_s19, 2  ;;  %s61_s20 = sadd.s32 1, %s979_s14 }
   0x6   : > { %p68_p1 = scmp.ne.s32.totalorder %s979_s14, %s975_s13  ;;  %p69_p2 = scmp.eq.s32.totalorder %s991_s17, 0 }
   0x7   : > { %s1174_s19 = smov (%p30_p0, %s28_s19), 0  ;;  %p74_p4 = scmp.ne.s32.totalorder %s975_s13, %s971_s12 }
   0x8   : > { %p1052_p3 = por %p69_p2, %p68_p1  ;;  %s58_s22 = ssub.s32 %s987_s16, %s1174_s19 }
   0x9   : > { %p75_p5 = scmp.eq.s32.totalorder %s680_s18, 0  ;;  %p59_p6 = scmp.eq.s32.totalorder %s58_s22, 0 }
   0xa   : > { %p858_p8 = scmp.lt.s32.totalorder %s991_s17, 2  ;;  %s160_s25 = sand.u32 1, %s979_s14  }
   0xb   : > { %p1059_p7 = por %p75_p5, %p74_p4  ;;  %s686_s26 = sshll.u32 %s987_s16, 2 }
   0xc   : > { %s1065_s24 = scalar_select %p59_p6, %s979_s14, %s61_s20  }
   0xd   : > { %s685_s27 = sshll.u32 %s160_s25, 8  ;;  %s168_s30 = scalar_lea.hbm %s1163_s1, %s686_s26 }
   0xe   : > { %s169_s4 = sshll.u32 %s168_s30, 4  ;;  %s164_s5 = scalar_lea.vmem [#allocation2], %s685_s27  ;;  %s170_s4 = int_to_ptr.hbm [resolvable:$true] %s169_s4 }
   0xf   : > { %s171_s6 = sshll.u32 %s164_s5, 4  ;;  %p855_p9 = pnand %p858_p8, %p1052_p3  ;;  %s172_s6 = int_to_ptr.vmem [resolvable:$true] %s171_s6 }
  0x10   : > { %p687_p10 = scmp.ge.s32.totalorder %s991_s17, 1  ;;  %s161_s7 = scalar_lea.sflag [#allocation3], %s160_s25 }
  0x11   : > { %s993_s8 = smov 128   ;;  %s994_s9 = smov 64  }
  0x12   : > { %s995_s10 = smov 4   ;;  %p185_p11 = scmp.lt.s32.totalorder %s991_s17, 3 }
  0x13   : > { %857 = dma.hbm_to_vmem [thread:$0]  (!%p855_p9), %s170_s4, 4096, %s172_s6, %s161_s7, %s993_s8, %s994_s9, %s995_s10  }
  0x14   : > { %p186_p12 = pnand %p687_p10, %p185_p11 }
  0x15   : > { %s191_s11 = sand.u32 (!%p186_p12), 1, %s975_s13  }
  0x16   : > { %189 = sbr.rel (%p186_p12) target bundleno = 203 (0xcb), region = 32  ;;  %s688_s12 = sshll.u32 (!%p186_p12), %s191_s11, 8 }
  0x17   : > { %s192_s18 = scalar_lea.sflag (!%p186_p12), [#allocation3], %s191_s11  ;;  %s1077_s20 = scalar_lea.vmem (!%p186_p12), [#allocation2], %s688_s12 }
  0x1b   : > { %966 = dma.done.wait (%p1059_p7), %s192_s18, 4096  }
  0x1c   : > { %968 = vsyncadd (%p1059_p7), %s192_s18, 4294963200  ;;  %v827_v0 = vld [vmem:[%s1077_s20 + $0x38] sm:$0xff]  ;;  %v826_v4 = vld [vmem:[%s1077_s20 + $0x30] sm:$0xff]  ;;  %p235_p13 = scmp.lt.s32.totalorder %s983_s15, 1 }
  0x1d   : > { %v835_v1 = vld [vmem:[%s1077_s20 + $0x78] sm:$0xff]  ;;  %514 = vmatpush.bf16.msra.mxu0 %v827_v0  ;;  %v834_v5 = vld [vmem:[%s1077_s20 + $0x70] sm:$0xff]  ;;  %v825_v8 = vld [vmem:[%s1077_s20 + $0x28] sm:$0xff] }
  0x1e   : > { %v843_v2 = vld [vmem:[%s1077_s20 + $0xb8] sm:$0xff]  ;;  %527 = vmatpush.bf16.msra.mxu1 %v835_v1  ;;  %v842_v6 = vld [vmem:[%s1077_s20 + $0xb0] sm:$0xff]  ;;  %v833_v9 = vld [vmem:[%s1077_s20 + $0x68] sm:$0xff]  ;;  %s1176_s15 = smov (!%p235_p13, %s983_s15), 1 }
  0x1f   : > { %v851_v3 = vld [vmem:[%s1077_s20 + $0xf8] sm:$0xff]  ;;  %540 = vmatpush.bf16.msra.mxu2 %v843_v2  ;;  %v850_v7 = vld [vmem:[%s1077_s20 + $0xf0] sm:$0xff]  ;;  %v841_v10 = vld [vmem:[%s1077_s20 + $0xa8] sm:$0xff]  ;;  %s237_s23 = scalar_lea.vmem %s1164_s2, %s1176_s15  ;;  %s689_s8 = sshll.u32 %s1176_s15, 3 }
  0x20   : > { %553 = vmatpush.bf16.msra.mxu3 %v851_v3  ;;  %v849_v11 = vld [vmem:[%s1077_s20 + $0xe8] sm:$0xff]  ;;  %v824_v12 = vld [vmem:[%s1077_s20 + $0x20] sm:$0xff]  ;;  %v823_v16 = vld [vmem:[%s1077_s20 + $0x18] sm:$0xff]  ;;  %s245_s11 = scalar_lea.vmem %s1165_s3, %s689_s8 }
  0x21   : > { %515 = vmatpush.bf16.msra.mxu0 %v826_v4  ;;  %v832_v13 = vld [vmem:[%s1077_s20 + $0x60] sm:$0xff]  ;;  %v831_v17 = vld [vmem:[%s1077_s20 + $0x58] sm:$0xff]  ;;  %v822_v20 = vld [vmem:[%s1077_s20 + $0x10] sm:$0xff] }
  0x22   : > { %528 = vmatpush.bf16.msra.mxu1 %v834_v5  ;;  %v840_v14 = vld [vmem:[%s1077_s20 + $0xa0] sm:$0xff]  ;;  %v839_v18 = vld [vmem:[%s1077_s20 + $0x98] sm:$0xff]  ;;  %v830_v21 = vld [vmem:[%s1077_s20 + $0x50] sm:$0xff] }
  0x23   : > { %541 = vmatpush.bf16.msra.mxu2 %v842_v6  ;;  %v848_v15 = vld [vmem:[%s1077_s20 + $0xe0] sm:$0xff]  ;;  %v847_v19 = vld [vmem:[%s1077_s20 + $0xd8] sm:$0xff]  ;;  %v838_v22 = vld [vmem:[%s1077_s20 + $0x90] sm:$0xff] }
  0x24   : > { %554 = vmatpush.bf16.msra.mxu3 %v850_v7  ;;  %v846_v23 = vld [vmem:[%s1077_s20 + $0xd0] sm:$0xff]  ;;  %v821_v24 = vld [vmem:[%s1077_s20 + $0x8] sm:$0xff]  ;;  %v820_v28 = vld [vmem:[%s1077_s20] sm:$0xff] }
  0x25   : > { %516 = vmatpush.bf16.msra.mxu0 %v825_v8  ;;  %v829_v25 = vld [vmem:[%s1077_s20 + $0x48] sm:$0xff]  ;;  %v828_v29 = vld [vmem:[%s1077_s20 + $0x40] sm:$0xff]  ;;  %v248_v34 = vld [vmem:[%s1162_s0 + $0x10] sm:$0xff] }
  0x26   : > { %529 = vmatpush.bf16.msra.mxu1 %v833_v9  ;;  %v837_v26 = vld [vmem:[%s1077_s20 + $0x88] sm:$0xff]  ;;  %v836_v30 = vld [vmem:[%s1077_s20 + $0x80] sm:$0xff]  ;;  %v249_v35 = vld [vmem:[%s1162_s0 + $0x18] sm:$0xff]  ;;  %v252_v38 = vpack.c.bf16 %v248_v34, %v248_v34 }
  0x27   : > { %542 = vmatpush.bf16.msra.mxu2 %v841_v10  ;;  %v845_v27 = vld [vmem:[%s1077_s20 + $0xc8] sm:$0xff]  ;;  %v246_v31 = vld [vmem:[%s1162_s0] sm:$0xff]  ;;  %v253_v39 = vpack.c.bf16 %v249_v35, %v249_v35 }
  0x28   : > { %555 = vmatpush.bf16.msra.mxu3 %v849_v11  ;;  %v247_v32 = vld [vmem:[%s1162_s0 + $0x8] sm:$0xff]  ;;  %v844_v33 = vld [vmem:[%s1077_s20 + $0xc0] sm:$0xff]  ;;  %v250_v36 = vpack.c.bf16 %v246_v31, %v246_v31 }
  0x29   : > { %517 = vmatpush.bf16.msra.mxu0 %v824_v12  ;;  %v251_v37 = vpack.c.bf16 %v247_v32, %v247_v32  ;;  %v910_v40 = vld [vmem:[%s237_s23] ss:$0 sm:$0xff] }
  0x2a   : > { %530 = vmatpush.bf16.msra.mxu1 %v832_v13 }
  0x2b   : > { %543 = vmatpush.bf16.msra.mxu2 %v840_v14 }
  0x2c   : > { %556 = vmatpush.bf16.msra.mxu3 %v848_v15 }
  0x2d   : > { %518 = vmatpush.bf16.msra.mxu0 %v823_v16 }
  0x2e   : > { %531 = vmatpush.bf16.msra.mxu1 %v831_v17 }
  0x2f   : > { %544 = vmatpush.bf16.msra.mxu2 %v839_v18 }
  0x30   : > { %557 = vmatpush.bf16.msra.mxu3 %v847_v19 }
  0x31   : > { %519 = vmatpush.bf16.msra.mxu0 %v822_v20 }
  0x32   : > { %532 = vmatpush.bf16.msra.mxu1 %v830_v21 }
  0x33   : > { %545 = vmatpush.bf16.msra.mxu2 %v838_v22 }
  0x34   : > { %558 = vmatpush.bf16.msra.mxu3 %v846_v23 }
  0x35   : > { %520 = vmatpush.bf16.msra.mxu0 %v821_v24 }
  0x36   : > { %533 = vmatpush.bf16.msra.mxu1 %v829_v25 }
  0x37   : > { %546 = vmatpush.bf16.msra.mxu2 %v837_v26 }
  0x38   : > { %559 = vmatpush.bf16.msra.mxu3 %v845_v27 }
  0x39   : > { %521 = vmatpush.bf16.msra.mxu0 %v820_v28 }
  0x3a   : > { %534 = vmatpush.bf16.msra.mxu1 %v828_v29 }
  0x3b   : > { %547 = vmatpush.bf16.msra.mxu2 %v836_v30 }
  0x3c   : > { %560 = vmatpush.bf16.msra.mxu3 %v844_v33  ;;  %522 = vmatmul.bf16.vlgmr.msra.gmra.mxu0 %v250_v36 }
  0x3d   : > { %535 = vmatmul.bf16.vlgmr.msra.gmra.mxu1 %v251_v37 }
  0x3e   : > { %548 = vmatmul.bf16.vlgmr.msra.gmra.mxu2 %v252_v38 }
  0x3f   : > { %561 = vmatmul.bf16.vlgmr.msra.gmra.mxu3 %v253_v39 }
  0xb9   : > { %v523_v41 = vpop.f32.mrf.mxu0 }
  0xba   : > { %v536_v42 = vpop.f32.mrf.mxu1  ;;  %v524_v43 = vadd.f32 %v910_v40, %v523_v41 }
  0xbc   : > { %v537_v44 = vadd.f32 %v536_v42, %v524_v43 }
  0xc1   : > { %v549_v45 = vpop.f32.mrf.mxu2  ;;  %v525_v48 = vpop.f32.mrf.mxu0 }
  0xc2   : > { %v562_v46 = vpop.f32.mrf.mxu3  ;;  %v550_v47 = vadd.f32 %v549_v45, %v537_v44  ;;  %v538_v49 = vpop.f32.mrf.mxu1 }
  0xc4   : > { %v563_v50 = vadd.f32 %v562_v46, %v550_v47 }
  0xc6   : > { %566 = vst [vmem:[%s245_s11] sm:$0xff] %v563_v50 }
  0xc9   : > { %v551_v51 = vpop.f32.mrf.mxu2 }
  0xca   : > { %v564_v52 = vpop.f32.mrf.mxu3 }
  0xcb PF: > { %s16_s17 = sadd.s32 1, %s991_s17   ;;  %s1168_s12 = smov %s975_s13 }
  0xcc   : > { %p13_p0 = scmp.ge.s32.totalorder %s16_s17, 4   ;;  %s1169_s13 = smov %s979_s14 }
  0xcd   : > { %s1170_s14 = smov %s1065_s24  ;;  %s1171_s15 = smov %s987_s16 }
  0xce   : > { %s1172_s16 = smov %s1174_s19  ;;  %15 = sbr.rel (!%p13_p0) target bundleno = 4 (0x4), region = 78 }
  0xd3   :  { %594 = vsyncpa [#allocation3], 1 }
  0xd4   :  { %596 = vsyncpa [#allocation3 + $0x1], 1 }

// kernel: _simulate.2
= control target key start
LH: loop header
LB: loop body
LE: loop exit
PB: predicated region body
PF: predicated region fallthrough
CT: control target
= control target key end

     0   :  { %s2401_s17 = smov 126   ;;  %s2402_s18 = smov 127   ;;  %v3863_v3 = vmov 3   ;;  %v3881_v4 = vmov 0   ;;  %v3864_v23 = vmov 1   ;;  %s3855_s0 = inlined_call_operand.vmem [shape: f32[8,6], index: 0, kind: input, shape index: {}]   ;;  %s3856_s3 = inlined_call_operand.vmem [shape: f32[1,256], index: 3, kind: input, shape index: {}]   ;;  %s3857_s1 = inlined_call_operand.vmem [shape: f32[1,256], index: 1, kind: input, shape index: {}]   ;;  %s3858_s2 = inlined_call_operand.vmem [shape: f32[1,256], index: 2, kind: input, shape index: {}]   ;;  %s3859_s4 = inlined_call_operand.vmem [shape: f32[8,512], index: 4, kind: output, shape index: {}]  }
   0x1   :  { %v2444_v0 = vld [vmem:[%s3855_s0] sm:$0xff]  ;;  %2366 = vset.pattern.permute.xlu1 %v3863_v3  ;;  %2365 = vset.pattern.permute.xlu0 %v3881_v4  ;;  %s2405_s0 = smov 1   ;;  %s2406_s19 = smov 125   ;;  %v3873_v42 = vmov 1326507024  }
   0x2   :  { %22 = vrot.lane.b32.xlu0 %v2444_v0, %s2401_s17  ;;  %v2448_v1 = vsub.f32 0.0, %v2444_v0  ;;  %2370 = vset.pattern.permute.xlu2 %v3881_v4  ;;  %v703_v5 = vmul.f32 %v2444_v0, %v2444_v0  ;;  %v18_v24 = vld [vmem:[%s3856_s3] sm:$0x3]  ;;  %v3879_v44 = vmov 920167782  }
   0x3   :  { %v19_v25 = vmul.f32 3.3356409e-09, %v18_v24  ;;  %v3871_v49 = vmov 2131351028   ;;  %v3869_v51 = vmov 2102212464  }
   0x4   :  { %v704_v2 = vmul.f32 %v2448_v1, %v2448_v1  ;;  %v3867_v56 = vmov 2475754826   ;;  %v3875_v62 = vmov 683565275  }
   0x5   :  { %v2470_v26 = vperm.slane %v19_v25, 0  ;;  %v2472_v27 = vperm.slane %v19_v25, 1 }
   0x6   :  { %706 = vrot.lane.b32.xlu2 %v704_v2, %s2402_s18 }
   0xe   :  { %38 = vrot.lane.b32.xlu2 %v2444_v0, %s2402_s18 }
  0x60   :  { %v707_v6 = vpop.permute.xlu2 %706 }
  0x61   :  { %v709_v7 = vadd.f32 %v707_v6, %v703_v5 }
  0x63   :  { %2379 = vrcp.f32 %v709_v7  ;;  %v721_v10 = vand.u32 2147483648, %v709_v7  ;;  %vm715_vm0 = vweird.f32 %v709_v7  ;;  %v719_v12 = vand.u32 2147483647, %v709_v7 }
  0x65   :  { %v722_v14 = vor.u32 1.1754944e-38, %v721_v10  ;;  %vm720_vm3 = vcmp.eq.f32.partialorder %v719_v12, 8.507059e+37 }
  0x68   :  { %v39_v21 = vpop.permute.xlu2 %38 }
  0x69   :  { %v2380_v8 = vpop.eup %2379  ;;  %v2461_v22 = vmul.f32 %v39_v21, %v2448_v1 }
  0x6a   :  { %v711_v9 = vmul.f32 %v2380_v8, %v709_v7  ;;  %vm716_vm1 = vweird.f32 %v2380_v8 }
  0x6b   :  { %vm717_vm2 = vmor %vm715_vm0, %vm716_vm1 }
  0x6c   :  { %v712_v11 = vsub.f32 1.0, %v711_v9 }
  0x6e   :  { %v713_v13 = vmul.f32 %v2380_v8, %v712_v11 }
  0x70   :  { %v714_v15 = vadd.f32 %v2380_v8, %v713_v13 }
  0x72   :  { %v718_v16 = vsel %vm717_vm2, %v2380_v8, %v714_v15 }
  0x73   :  { %v723_v17 = vsel %vm720_vm3, %v722_v14, %v718_v16 }
  0x74   :  { %v23_v18 = vpop.permute.xlu0 %22  ;;  %728 = vrot.lane.b32.xlu2 %v723_v17, %s2405_s0  ;;  %v725_v20 = vmul.f32 %v723_v17, %v2444_v0 }
  0x75   :  { %v25_v19 = vmul.f32 %v23_v18, %v2444_v0 }
  0x77   :  { %782 = vperm.xlu1 %2366, %v25_v19   ;;  %28 = vperm.xlu0 %2365, %v25_v19  }
  0x7c   :  { %736 = vperm.xlu2 %2370, %v725_v20  }
  0x7f   :  { %777 = vrot.lane.b32.xlu1 %v2444_v0, %s2406_s19  ;;  %2368 = vset.pattern.permute.xlu0 %v3864_v23 }
  0x80   :  { %44 = vperm.xlu0 %2368, %v2461_v22  }
  0x84   :  { %2371 = vset.pattern.permute.xlu2 %v3863_v3 }
  0x85   :  { %1450 = vperm.xlu2 %2371, %v725_v20  }
  0xe9   :  { %v783_v28 = vpop.permute.xlu1 %782  ;;  %v2497_v55 = vpop.permute.xlu0 %28 }
  0xea   :  { %v2475_v29 = vmul.f32 %v783_v28, %v2470_v26  ;;  %v2478_v30 = vmul.f32 %v783_v28, %v2472_v27  ;;  %v2506_v5 = vmul.f32 %v2470_v26, %v2497_v55 }
  0xec   :  { %3909 = vst [vmem:[#allocation2_spill] sm:$0xff] %v2478_v30  ;;  %v822_v31 = vand.u32 2139095040, %v2475_v29  ;;  %v976_v32 = vand.u32 2139095040, %v2478_v30  ;;  %v3862_v46 = vand.u32 2147483647, %v2475_v29  ;;  %v78_v17 = vand.u32 2139095040, %v2506_v5 }
  0xed   :  { %v3860_v12 = vand.u32 2147483647, %v2478_v30 }
  0xee   :  { %v823_v33 = vshrl.u32 %v822_v31, 23  ;;  %v977_v34 = vshrl.u32 %v976_v32, 23  ;;  %v826_v6 = vand.u32 8388607, %v3862_v46  ;;  %v79_v32 = vshrl.u32 %v78_v17, 23 }
  0xef   :  { %v980_v21 = vand.u32 8388607, %v3860_v12 }
  0xf0   :  { %v2326_v35 = vadd.s32 4294967169, %v823_v33  ;;  %v2329_v37 = vadd.s32 4294967169, %v977_v34  ;;  %v827_v14 = vor.u32 8388608, %v826_v6  ;;  %v2314_v6 = vadd.s32 4294967169, %v79_v32 }
  0xf2   :  { %v829_v36 = vadd.s32 1, %v2326_v35  ;;  %v983_v40 = vadd.s32 1, %v2329_v37  ;;  %v2553_v28 = vshll.u32 %v827_v14, 8 }
  0xf4   :  { %vm830_vm4 = vcmp.gt.s32.totalorder %v829_v36, 0  ;;  %vm984_vm5 = vcmp.gt.s32.totalorder %v983_v40, 0 }
  0xf5   :  { %v831_v38 = vsel %vm830_vm4, %v829_v36, 0  ;;  %v985_v54 = vsel %vm984_vm5, %v983_v40, 0 }
  0xf6   :  { %v833_v39 = vand.u32 31, %v831_v38  ;;  %v2489_v47 = vshrl.u32 %v831_v38, 5  ;;  %v987_v2 = vand.u32 31, %v985_v54  ;;  %v2556_v33 = vshrl.u32 %v985_v54, 5 }
  0xf8   :  { %v2482_v41 = vsub.s32 32, %v833_v39  ;;  %v848_v48 = vshll.u32 %v3879_v44, %v833_v39  ;;  %v845_v53 = vshll.u32 %v3869_v51, %v833_v39  ;;  %v839_v59 = vshll.u32 %v3867_v56, %v833_v39 }
  0xf9   :  { %v842_v60 = vshll.u32 %v3871_v49, %v833_v39  ;;  %v836_v63 = vshll.u32 %v3875_v62, %v833_v39  ;;  %vm854_vm6 = vcmp.lt.s32.totalorder %v2489_v47, 4  ;;  %vm851_vm7 = vcmp.lt.s32.totalorder %v2489_v47, 1 }
  0xfa   :  { %v849_v43 = vshrl.u32 %v3873_v42, %v2482_v41  ;;  %v846_v45 = vshrl.u32 %v3879_v44, %v2482_v41  ;;  %v840_v50 = vshrl.u32 %v3871_v49, %v2482_v41  ;;  %v843_v52 = vshrl.u32 %v3869_v51, %v2482_v41 }
  0xfb   :  { %v837_v57 = vshrl.u32 %v3867_v56, %v2482_v41  ;;  %vm853_vm8 = vcmp.lt.s32.totalorder %v2489_v47, 3  ;;  %v2524_v13 = vsub.s32 32, %v987_v2  ;;  %vm852_vm9 = vcmp.lt.s32.totalorder %v2489_v47, 2 }
  0xfc   :  { %v850_v58 = vor.u32 %v849_v43, %v848_v48  ;;  %v847_v61 = vor.u32 %v846_v45, %v845_v53  ;;  %v2510_v7 = vor.u32 %v840_v50, %v839_v59  ;;  %v2512_v8 = vor.u32 %v843_v52, %v842_v60 }
  0xfd   :  { %v2515_v9 = vor.u32 %v837_v57, %v836_v63  ;;  %v1000_v24 = vshrl.u32 %v3879_v44, %v2524_v13  ;;  %v999_v31 = vshll.u32 %v3869_v51, %v987_v2  ;;  %v991_v34 = vshrl.u32 %v3867_v56, %v2524_v13 }
  0xfe   :  { %v864_v10 = vsel %vm854_vm6, %v850_v58, 1326507024  ;;  %v860_v11 = vsel %vm854_vm6, %v847_v61, 920167782  ;;  %v863_v15 = vsel %vm851_vm7, %v2510_v7, %v2512_v8  ;;  %v994_v35 = vshrl.u32 %v3871_v49, %v2524_v13 }
  0xff   :  { %v865_v16 = vsel %vm853_vm8, %v847_v61, %v864_v10  ;;  %v859_v18 = vsel %vm851_vm7, %v2515_v9, %v2510_v7  ;;  %v861_v19 = vsel %vm853_vm8, %v2512_v8, %v860_v11  ;;  %v997_v36 = vshrl.u32 %v3869_v51, %v2524_v13 }
 0x100   :  { %v2543_v20 = vsel %vm852_vm9, %v863_v15, %v865_v16  ;;  %v2551_v25 = vsel %vm852_vm9, %v859_v18, %v861_v19  ;;  %v1001_v38 = vor.u32 %v1000_v24, %v999_v31  ;;  %v1002_v39 = vshll.u32 %v3879_v44, %v987_v2 }
 0x101   :  { %v871_v37 = vshrl.u32 %v2543_v20, 16  ;;  %v1003_v40 = vshrl.u32 %v3873_v42, %v2524_v13  ;;  %v893_v43 = vshrl.u32 %v2551_v25, 16  ;;  %v990_v45 = vshll.u32 %v3875_v62, %v987_v2 }
 0x102   :  { %v993_v48 = vshll.u32 %v3867_v56, %v987_v2  ;;  %v996_v50 = vshll.u32 %v3871_v49, %v987_v2  ;;  %v868_v52 = vand.u32 65535, %v2553_v28  ;;  %vm1008_vm10 = vcmp.lt.s32.totalorder %v2556_v33, 4 }
 0x103   :  { %v1004_v53 = vor.u32 %v1003_v40, %v1002_v39  ;;  %v2573_v54 = vor.u32 %v991_v34, %v990_v45  ;;  %v1014_v60 = vsel %vm1008_vm10, %v1001_v38, 920167782  ;;  %v981_v63 = vor.u32 8388608, %v980_v21 }
 0x104   :  { %v2575_v57 = vor.u32 %v994_v35, %v993_v48  ;;  %v2577_v58 = vor.u32 %v997_v36, %v996_v50  ;;  %v2580_v59 = vmul.u32 %v871_v37, %v868_v52  ;;  %v2584_v61 = vmul.u32 %v893_v43, %v868_v52 }
 0x105   :  { %v1018_v2 = vsel %vm1008_vm10, %v1004_v53, 1326507024  ;;  %v870_v10 = vand.u32 65535, %v2543_v20  ;;  %v892_v11 = vand.u32 65535, %v2551_v25  ;;  %vm1005_vm11 = vcmp.lt.s32.totalorder %v2556_v33, 1 }
 0x106   :  { %vm1007_vm12 = vcmp.lt.s32.totalorder %v2556_v33, 3  ;;  %v1013_v14 = vsel %vm1005_vm11, %v2573_v54, %v2575_v57  ;;  %v1017_v16 = vsel %vm1005_vm11, %v2575_v57, %v2577_v58  ;;  %v869_v18 = vshrl.u32 %v2553_v28, 16 }
 0x107   :  { %v1015_v15 = vsel %vm1007_vm12, %v2577_v58, %v1014_v60  ;;  %v1019_v17 = vsel %vm1007_vm12, %v1001_v38, %v1018_v2  ;;  %v876_v19 = vshll.u32 %v2580_v59, 16  ;;  %v898_v20 = vshll.u32 %v2584_v61, 16 }
 0x108   :  { %vm1006_vm13 = vcmp.lt.s32.totalorder %v2556_v33, 2  ;;  %v85_v21 = vadd.s32 1, %v2314_v6  ;;  %v872_v24 = vmul.u32 %v870_v10, %v868_v52  ;;  %v2609_v25 = vmul.u32 %v870_v10, %v869_v18 }
 0x109   :  { %v2613_v31 = vsel %vm1006_vm13, %v1013_v14, %v1015_v15  ;;  %v2617_v32 = vsel %vm1006_vm13, %v1017_v16, %v1019_v17  ;;  %v894_v34 = vmul.u32 %v892_v11, %v868_v52  ;;  %v2619_v35 = vmul.u32 %v892_v11, %v869_v18 }
 0x10a   :  { %v2621_v36 = vshll.u32 %v981_v63, 8  ;;  %v3861_v38 = vand.u32 2147483647, %v2506_v5  ;;  %vm880_vm14 = vc.u32 %v872_v24, %v876_v19  ;;  %v882_v39 = vadd.s32 %v876_v19, %v872_v24 }
 0x10b   :  { %vm902_vm15 = vc.u32 %v894_v34, %v898_v20  ;;  %v2624_v40 = vadd.s32 %v898_v20, %v894_v34  ;;  %v1025_v45 = vshrl.u32 %v2617_v32, 16  ;;  %v1047_v48 = vshrl.u32 %v2613_v31, 16 }
 0x10c   :  { %v878_v50 = vshll.u32 %v2609_v25, 16  ;;  %vm86_vm0 = vcmp.gt.s32.totalorder %v85_v21, 0  ;;  %v881_v52 = vsel %vm880_vm14, 1, %v3881_v4  ;;  %v3866_v53 = vshll.u32 %v2619_v35, 16 }
 0x10d   :  { %v1022_v60 = vand.u32 65535, %v2621_v36  ;;  %v2634_v63 = vand.u32 8388607, %v3861_v38  ;;  %v875_v2 = vmul.u32 %v871_v37, %v869_v18  ;;  %v897_v6 = vmul.u32 %v893_v43, %v869_v18 }
 0x10e   :  { %vm884_vm1 = vc.u32 %v882_v39, %v878_v50  ;;  %v903_v10 = vsel %vm902_vm15, 1, %v3881_v4  ;;  %vm906_vm2 = vc.u32 %v2624_v40, %v3866_v53  ;;  %v87_v15 = vsel %vm86_vm0, %v85_v21, 0 }
 0x10f   :  { %v2640_v11 = vmul.u32 %v1025_v45, %v1022_v60  ;;  %v2642_v14 = vmul.u32 %v1047_v48, %v1022_v60  ;;  %v883_v16 = vadd.s32 %v881_v52, %v875_v2  ;;  %v905_v17 = vadd.s32 %v903_v10, %v897_v6 }
 0x110   :  { %v1024_v19 = vand.u32 65535, %v2617_v32  ;;  %v1046_v20 = vand.u32 65535, %v2613_v31  ;;  %v89_v37 = vand.u32 31, %v87_v15  ;;  %v885_v43 = vsel %vm884_vm1, 1, %v3881_v4 }
 0x111   :  { %v907_v18 = vsel %vm906_vm2, 1, %v3881_v4  ;;  %v2650_v24 = vmul.f32 %v2472_v27, %v2497_v55  ;;  %v1030_v34 = vshll.u32 %v2640_v11, 16  ;;  %v1052_v39 = vshll.u32 %v2642_v14, 16 }
 0x112   :  { %v83_v21 = vor.u32 8388608, %v2634_v63  ;;  %v2655_v50 = vsub.s32 32, %v89_v37  ;;  %v835_v31 = vshrl.u32 %v3875_v62, %v2482_v41  ;;  %v856_v32 = vsel %vm854_vm6, %v2512_v8, 2102212464 }
 0x113   :  { %v877_v52 = vshrl.u32 %v2580_v59, 16  ;;  %v1023_v55 = vshrl.u32 %v2621_v36, 16  ;;  %v887_v2 = vadd.s32 %v885_v43, %v883_v16  ;;  %v909_v6 = vadd.s32 %v907_v18, %v905_v17 }
 0x114   :  { %v1026_v10 = vmul.u32 %v1024_v19, %v1022_v60  ;;  %v1048_v12 = vmul.u32 %v1046_v20, %v1022_v60  ;;  %v93_v46 = vshrl.u32 %v3867_v56, %v2655_v50  ;;  %v96_v41 = vshrl.u32 %v3871_v49, %v2655_v50 }
 0x115   :  { %v2664_v38 = vmul.u32 %v1024_v19, %v1023_v55  ;;  %v2666_v63 = vmul.u32 %v1046_v20, %v1023_v55  ;;  %v99_v60 = vshrl.u32 %v3869_v51, %v2655_v50  ;;  %v92_v16 = vshll.u32 %v3875_v62, %v89_v37 }
 0x116   :  { %v1036_v3 = vadd.s32 %v1030_v34, %v1026_v10  ;;  %vm2672_vm3 = vc.u32 %v1048_v12, %v1052_v39  ;;  %v2676_v59 = vadd.s32 %v1052_v39, %v1048_v12  ;;  %v95_v17 = vshll.u32 %v3867_v56, %v89_v37 }
 0x117   :  { %v101_v19 = vshll.u32 %v3869_v51, %v89_v37  ;;  %v102_v20 = vshrl.u32 %v3879_v44, %v2655_v50  ;;  %vm1034_vm4 = vc.u32 %v1026_v10, %v1030_v34  ;;  %v2685_v43 = vshrl.u32 %v87_v15, 5 }
 0x118   :  { %v98_v18 = vshll.u32 %v3871_v49, %v89_v37  ;;  %v105_v12 = vshrl.u32 %v3873_v42, %v2655_v50  ;;  %v1032_v39 = vshll.u32 %v2664_v38, 16  ;;  %v2691_v23 = vor.u32 %v93_v46, %v92_v16 }
 0x119   :  { %v2693_v53 = vor.u32 %v96_v41, %v95_v17  ;;  %v103_v56 = vor.u32 %v102_v20, %v101_v19  ;;  %v1054_v51 = vshll.u32 %v2666_v63, 16  ;;  %v1057_v34 = vsel %vm2672_vm3, 1, %v3881_v4 }
 0x11a   :  { %v2699_v15 = vor.u32 %v99_v60, %v98_v18  ;;  %v104_v10 = vshll.u32 %v3879_v44, %v89_v37  ;;  %v1029_v49 = vmul.u32 %v1025_v45, %v1023_v55  ;;  %v1035_v42 = vsel %vm1034_vm4, 1, %v3881_v4 }
 0x11b   :  { %vm1038_vm5 = vc.u32 %v1036_v3, %v1032_v39  ;;  %v1051_v62 = vmul.u32 %v1047_v48, %v1023_v55  ;;  %vm1060_vm6 = vc.u32 %v2676_v59, %v1054_v51  ;;  %vm107_vm14 = vcmp.lt.s32.totalorder %v2685_v43, 1 }
 0x11c   :  { %v106_v46 = vor.u32 %v105_v12, %v104_v10  ;;  %vm110_vm15 = vcmp.lt.s32.totalorder %v2685_v43, 4  ;;  %vm109_vm0 = vcmp.lt.s32.totalorder %v2685_v43, 3  ;;  %v115_v45 = vsel %vm107_vm14, %v2691_v23, %v2693_v53 }
 0x11d   :  { %v1059_v41 = vadd.s32 %v1057_v34, %v1051_v62  ;;  %v116_v3 = vsel %vm110_vm15, %v103_v56, 920167782  ;;  %v1037_v48 = vadd.s32 %v1035_v42, %v1029_v49  ;;  %v1039_v37 = vsel %vm1038_vm5, 1, %v3881_v4 }
 0x11e   :  { %vm108_vm1 = vcmp.lt.s32.totalorder %v2685_v43, 2  ;;  %v117_v55 = vsel %vm109_vm0, %v2699_v15, %v116_v3  ;;  %v1061_v62 = vsel %vm1060_vm6, 1, %v3881_v4  ;;  %v119_v60 = vsel %vm107_vm14, %v2693_v53, %v2699_v15  ;;  %v729_v43 = vpop.permute.xlu2 %728 }
 0x11f   :  { %v2723_v8 = vsel %vm108_vm1, %v115_v45, %v117_v55  ;;  %v2729_v42 = vshll.u32 %v83_v21, 8  ;;  %v855_v49 = vsel %vm851_vm7, %v835_v31, %v2515_v9  ;;  %v857_v16 = vsel %vm853_vm8, %v2510_v7, %v856_v32 }
 0x120   :  { %v3912_v17 = vmov 683565275   ;;  %v120_v20 = vsel %vm110_vm15, %v106_v46, 1326507024  ;;  %v879_v18 = vshrl.u32 %v2609_v25, 16  ;;  %v888_v12 = vadd.s32 %v887_v2, %v877_v52 }
 0x121   :  { %v989_v19 = vshrl.u32 %v3912_v17, %v2524_v13  ;;  %v899_v21 = vshrl.u32 %v2584_v61, 16  ;;  %v121_v39 = vsel %vm109_vm0, %v103_v56, %v120_v20  ;;  %v1041_v34 = vadd.s32 %v1039_v37, %v1037_v48 }
 0x122   :  { %v1063_v9 = vadd.s32 %v1061_v62, %v1059_v41  ;;  %v122_v31 = vsel %vm108_vm1, %v119_v60, %v121_v39  ;;  %v149_v7 = vshrl.u32 %v2723_v8, 16  ;;  %v1010_v13 = vsel %vm1008_vm10, %v2577_v58, 2102212464 }
 0x123   :  { %v910_v32 = vadd.s32 %v909_v6, %v899_v21  ;;  %v1053_v25 = vshrl.u32 %v2642_v14, 16  ;;  %v124_v52 = vand.u32 65535, %v2729_v42  ;;  %v1031_v61 = vshrl.u32 %v2640_v11, 16 }
 0x124   :  { %v126_v2 = vand.u32 65535, %v122_v31  ;;  %v127_v56 = vshrl.u32 %v122_v31, 16  ;;  %v148_v10 = vand.u32 65535, %v2723_v8  ;;  %v901_v46 = vshrl.u32 %v2619_v35, 16 }
 0x125   :  { %v1009_v6 = vsel %vm1005_vm11, %v989_v19, %v2573_v54  ;;  %v125_v41 = vshrl.u32 %v2729_v42, 16  ;;  %v151_v45 = vmul.u32 %v149_v7, %v124_v52  ;;  %v1011_v58 = vsel %vm1007_vm12, %v2575_v57, %v1010_v13 }
 0x126   :  { %v1042_v14 = vadd.s32 %v1041_v34, %v1031_v61  ;;  %v1064_v3 = vadd.s32 %v1063_v9, %v1053_v25  ;;  %v129_v11 = vmul.u32 %v127_v56, %v124_v52  ;;  %v2763_v48 = vadd.s32 %v888_v12, %v879_v18 }
 0x127   :  { %v911_v37 = vadd.s32 %v910_v32, %v901_v46  ;;  %v1033_v55 = vshrl.u32 %v2664_v38, 16  ;;  %v130_v62 = vmul.u32 %v126_v2, %v125_v41  ;;  %v1055_v8 = vshrl.u32 %v2666_v63, 16 }
 0x128   :  { %v128_v60 = vmul.u32 %v126_v2, %v124_v52  ;;  %v132_v54 = vshll.u32 %v129_v11, 16  ;;  %v152_v19 = vmul.u32 %v148_v10, %v125_v41  ;;  %v858_v20 = vsel %vm852_vm9, %v855_v49, %v857_v16 }
 0x129   :  { %v3913_v21 = vshll.u32 %v2619_v35, 16  ;;  %v1012_v18 = vsel %vm1006_vm13, %v1009_v6, %v1011_v58  ;;  %v154_v12 = vshll.u32 %v151_v45, 16  ;;  %v2776_v39 = vadd.s32 %v1042_v14, %v1033_v55 }
 0x12a   :  { %v1065_v38 = vadd.s32 %v1064_v3, %v1055_v8  ;;  %vm136_vm7 = vc.u32 %v128_v60, %v132_v54  ;;  %v138_v34 = vadd.s32 %v132_v54, %v128_v60  ;;  %v131_v9 = vmul.u32 %v127_v56, %v125_v41 }
 0x12b   :  { %v2772_v57 = vadd.s32 %v2624_v40, %v3913_v21  ;;  %v134_v31 = vshll.u32 %v130_v62, 16  ;;  %v137_v32 = vsel %vm136_vm7, 1, %v3881_v4  ;;  %v150_v47 = vmul.u32 %v148_v10, %v124_v52 }
 0x12c   :  { %v915_v35 = vadd.s32 1, %v911_v37  ;;  %v2784_v33 = vadd.s32 %v2676_v59, %v1054_v51  ;;  %v156_v40 = vshll.u32 %v152_v19, 16  ;;  %v139_v49 = vadd.s32 %v137_v32, %v131_v9 }
 0x12d   :  { %vm914_vm8 = vc.u32 %v2763_v48, %v2772_v57  ;;  %vm140_vm9 = vc.u32 %v138_v34, %v134_v31  ;;  %vm158_vm10 = vc.u32 %v150_v47, %v154_v12  ;;  %v160_v16 = vadd.s32 %v154_v12, %v150_v47 }
 0x12e   :  { %vm1068_vm11 = vc.u32 %v2776_v39, %v2784_v33  ;;  %v1069_v13 = vadd.s32 1, %v1065_v38  ;;  %v141_v25 = vsel %vm140_vm9, 1, %v3881_v4  ;;  %v153_v52 = vmul.u32 %v149_v7, %v125_v41 }
 0x12f   :  { %v133_v61 = vshrl.u32 %v129_v11, 16  ;;  %v143_v2 = vadd.s32 %v141_v25, %v139_v49  ;;  %v159_v56 = vsel %vm158_vm10, 1, %v3881_v4  ;;  %vm162_vm12 = vc.u32 %v160_v16, %v156_v40 }
 0x130   :  { %v912_v51 = vmul.u32 %v2553_v28, %v858_v20  ;;  %v916_v63 = vsel %vm914_vm8, %v915_v35, %v911_v37  ;;  %v112_v59 = vsel %vm110_vm15, %v2699_v15, 2102212464  ;;  %v161_v10 = vadd.s32 %v159_v56, %v153_v52 }
 0x131   :  { %v91_v46 = vshrl.u32 %v3912_v17, %v2655_v50  ;;  %v135_v7 = vshrl.u32 %v130_v62, 16  ;;  %v144_v6 = vadd.s32 %v143_v2, %v133_v61  ;;  %v163_v41 = vsel %vm162_vm12, 1, %v3881_v4 }
 0x132   :  { %v1066_v58 = vmul.u32 %v2621_v36, %v1012_v18  ;;  %v1070_v28 = vsel %vm1068_vm11, %v1069_v13, %v1065_v38  ;;  %v155_v14 = vshrl.u32 %v151_v45, 16  ;;  %v165_v3 = vadd.s32 %v163_v41, %v161_v10  ;;  %v778_v45 = vpop.permute.xlu1 %777 }
 0x133   :  { %v111_v15 = vsel %vm107_vm14, %v91_v46, %v2691_v23  ;;  %v113_v50 = vsel %vm109_vm0, %v2693_v53, %v112_v59  ;;  %v2810_v11 = vadd.s32 %v144_v6, %v135_v7  ;;  %v232_v37 = vand.u32 2139095040, %v2650_v24 }
 0x134   :  { %v2813_v55 = vadd.s32 %v916_v63, %v912_v51  ;;  %v157_v36 = vshrl.u32 %v152_v19, 16  ;;  %v2815_v62 = vadd.s32 %v160_v16, %v156_v40  ;;  %v166_v8 = vadd.s32 %v165_v3, %v155_v14 }
 0x135   :  { %v1071_v60 = vadd.s32 %v1070_v28, %v1066_v58  ;;  %v233_v54 = vshrl.u32 %v232_v37, 23  ;;  %v114_v23 = vsel %vm108_vm1, %v111_v15, %v113_v50  ;;  %v2414_v53 = vmov 4  }
 0x136   :  { %v167_v20 = vadd.s32 %v166_v8, %v157_v36  ;;  %vm170_vm13 = vc.u32 %v2810_v11, %v2815_v62  ;;  %2375 = vset.pattern.permute.xlu2 %v2414_v53  ;;  %2373 = vset.pattern.permute.xlu0 %v2414_v53  ;;  %v780_v19 = vadd.f32 %v778_v45, %v2444_v0  ;;  %v726_v18 = vsub.f32 0.0, %v2448_v1 }
 0x137   :  { %v2317_v21 = vadd.s32 4294967169, %v233_v54  ;;  %1476 = vperm.xlu2 %2375, %v2448_v1   ;;  %v918_v12 = vadd.s32 536870912, %v2813_v55  ;;  %v2415_v34 = vmov 2   ;;  %v1072_v9 = vadd.s32 536870912, %v1071_v60 }
 0x138   :  { %v171_v38 = vadd.s32 1, %v167_v20  ;;  %2367 = vset.pattern.permute.xlu1 %v2415_v34  ;;  %v168_v31 = vmul.u32 %v2729_v42, %v114_v23  ;;  %v731_v47 = vmul.f32 %v729_v43, %v726_v18  ;;  %v229_v16 = vand.u32 2147483647, %v2650_v24 }
 0x139   :  { %v239_v32 = vadd.s32 1, %v2317_v21  ;;  %1645 = vperm.xlu1 %2367, %v780_v19   ;;  %v2829_v49 = vshrl.u32 %v918_v12, 30  ;;  %v2832_v25 = vshrl.u32 %v1072_v9, 30  ;;  %v3914_v2 = vmov 1  }
 0x13a   :  { %v172_v35 = vsel %vm170_vm13, %v171_v38, %v167_v20  ;;  %1456 = vperm.xlu0 %2373, %v731_v47   ;;  %v236_v51 = vand.u32 8388607, %v229_v16  ;;  %v3915_v46 = vmov 2475754826   ;;  %v3916_v41 = vmov 2131351028  }
 0x13b   :  { %v173_v40 = vadd.s32 %v172_v35, %v168_v31  ;;  %vm240_vm2 = vcmp.gt.s32.totalorder %v239_v32, 0  ;;  %v920_v56 = vshll.u32 %v2829_v49, 30  ;;  %v1074_v63 = vshll.u32 %v2832_v25, 30 }
 0x13c   :  { %v241_v13 = vsel %vm240_vm2, %v239_v32, 0  ;;  %v3917_v28 = vmov 2102212464   ;;  %v3918_v37 = vmov 1326507024   ;;  %v237_v8 = vor.u32 8388608, %v236_v51 }
 0x13d   :  { %v174_v52 = vadd.s32 536870912, %v173_v40  ;;  %v243_v61 = vand.u32 31, %v241_v13  ;;  %v2855_v3 = vshrl.u32 %v241_v13, 5  ;;  %v2868_v19 = vsub.s32 %v2813_v55, %v920_v56 }
 0x13e   :  { %v2871_v18 = vsub.s32 %v1071_v60, %v1074_v63  ;;  %v2878_v38 = vshll.u32 %v237_v8, 8 }
 0x13f   :  { %v2834_v42 = vsub.s32 32, %v243_v61  ;;  %2377 = vset.pattern.permute.xlu2 %v3914_v2  ;;  %v2842_v59 = vshrl.u32 %v174_v52, 30  ;;  %v246_v10 = vshll.u32 %v3912_v17, %v243_v61  ;;  %v249_v6 = vshll.u32 %v3915_v46, %v243_v61 }
 0x140   :  { %764 = vperm.xlu2 %2377, %v2448_v1   ;;  %v252_v15 = vshll.u32 %v3916_v41, %v243_v61  ;;  %v255_v50 = vshll.u32 %v3917_v28, %v243_v61  ;;  %v258_v23 = vshll.u32 %v3879_v44, %v243_v61  ;;  %vm261_vm3 = vcmp.lt.s32.totalorder %v2855_v3, 1 }
 0x141   :  { %v247_v7 = vshrl.u32 %v3915_v46, %v2834_v42  ;;  %2369 = vset.pattern.permute.xlu1 %v2414_v53  ;;  %v250_v58 = vshrl.u32 %v3916_v41, %v2834_v42  ;;  %v253_v14 = vshrl.u32 %v3917_v28, %v2834_v42  ;;  %v256_v1 = vshrl.u32 %v3879_v44, %v2834_v42 }
 0x142   :  { %790 = vperm.xlu1 %2369, %v2461_v22   ;;  %v259_v36 = vshrl.u32 %v3918_v37, %v2834_v42  ;;  %2378 = vset.pattern.permute.xlu0 %v2415_v34  ;;  %v176_v22 = vshll.u32 %v2842_v59, 30  ;;  %vm264_vm4 = vcmp.lt.s32.totalorder %v2855_v3, 4  ;;  %vm263_vm5 = vcmp.lt.s32.totalorder %v2855_v3, 3 }
 0x143   :  { %v2861_v45 = vor.u32 %v247_v7, %v246_v10  ;;  %v2863_v54 = vor.u32 %v250_v58, %v249_v6  ;;  %v254_v20 = vor.u32 %v253_v14, %v252_v15  ;;  %v257_v53 = vor.u32 %v256_v1, %v255_v50 }
 0x144   :  { %v260_v21 = vor.u32 %v259_v36, %v258_v23  ;;  %v2888_v43 = vsub.s32 %v173_v40, %v176_v22  ;;  %vm262_vm6 = vcmp.lt.s32.totalorder %v2855_v3, 2  ;;  %vm922_vm14 = vcmp.lt.s32.totalorder %v2868_v19, 0 }
 0x145   :  { %v269_v12 = vsel %vm261_vm3, %v2861_v45, %v2863_v54  ;;  %v270_v34 = vsel %vm264_vm4, %v257_v53, 920167782  ;;  %v273_v55 = vsel %vm261_vm3, %v2863_v54, %v254_v20  ;;  %v923_v31 = vsub.s32 0, %v2868_v19 }
 0x146   :  { %v274_v60 = vsel %vm264_vm4, %v260_v21, 1326507024  ;;  %v271_v9 = vsel %vm263_vm5, %v254_v20, %v270_v34  ;;  %v1077_v40 = vsub.s32 0, %v2871_v18  ;;  %v278_v52 = vand.u32 65535, %v2878_v38 }
 0x147   :  { %v272_v32 = vsel %vm262_vm6, %v269_v12, %v271_v9  ;;  %v275_v35 = vsel %vm263_vm5, %v257_v53, %v274_v60  ;;  %vm1076_vm15 = vcmp.lt.s32.totalorder %v2871_v18, 0  ;;  %v179_v10 = vsub.s32 0, %v2888_v43 }
 0x148   :  { %v276_v13 = vsel %vm262_vm6, %v273_v55, %v275_v35  ;;  %v302_v61 = vand.u32 65535, %v272_v32  ;;  %v303_v63 = vshrl.u32 %v272_v32, 16  ;;  %v924_v7 = vsel %vm922_vm14, %v923_v31, %v2868_v19 }
 0x149   :  { %v280_v56 = vand.u32 65535, %v276_v13  ;;  %v281_v51 = vshrl.u32 %v276_v13, 16  ;;  %vm178_vm0 = vcmp.lt.s32.totalorder %v2888_v43, 0  ;;  %v1078_v1 = vsel %vm1076_vm15, %v1077_v40, %v2871_v18 }
 0x14a   :  { %2372 = vset.pattern.permute.xlu1 %v3914_v2  ;;  %v279_v2 = vshrl.u32 %v2878_v38, 16  ;;  %v305_v58 = vmul.u32 %v303_v63, %v278_v52  ;;  %v925_v36 = vclz %v924_v7  ;;  %v180_v8 = vsel %vm178_vm0, %v179_v10, %v2888_v43 }
 0x14b   :  { %743 = vperm.xlu1 %2372, %v731_v47   ;;  %v283_v47 = vmul.u32 %v281_v51, %v278_v52  ;;  %v282_v15 = vmul.u32 %v280_v56, %v278_v52  ;;  %v304_v23 = vmul.u32 %v302_v61, %v278_v52  ;;  %v3919_v34 = vmov 3  }
 0x14c   :  { %v284_v6 = vmul.u32 %v280_v56, %v279_v2  ;;  %v306_v14 = vmul.u32 %v302_v61, %v279_v2  ;;  %v308_v53 = vshll.u32 %v305_v58, 16  ;;  %v285_v22 = vmul.u32 %v281_v51, %v279_v2 }
 0x14d   :  { %v286_v50 = vshll.u32 %v283_v47, 16  ;;  %v1079_v55 = vclz %v1078_v1  ;;  %v307_v9 = vmul.u32 %v303_v63, %v279_v2  ;;  %v181_v40 = vclz %v180_v8 }
 0x14e   :  { %v288_v21 = vshll.u32 %v284_v6, 16  ;;  %v310_v31 = vshll.u32 %v306_v14, 16  ;;  %vm312_vm8 = vc.u32 %v304_v23, %v308_v53  ;;  %v314_v35 = vadd.s32 %v308_v53, %v304_v23 }
 0x14f   :  { %vm290_vm1 = vc.u32 %v282_v15, %v286_v50  ;;  %v292_v12 = vadd.s32 %v286_v50, %v282_v15  ;;  %v266_v13 = vsel %vm264_vm4, %v254_v20, 2102212464  ;;  %v313_v61 = vsel %vm312_vm8, 1, %v3881_v4 }
 0x150   :  { %v291_v60 = vsel %vm290_vm1, 1, %v3881_v4  ;;  %v287_v56 = vshrl.u32 %v283_v47, 16  ;;  %v315_v10 = vadd.s32 %v313_v61, %v307_v9  ;;  %vm316_vm9 = vc.u32 %v314_v35, %v310_v31 }
 0x151   :  { %v293_v32 = vadd.s32 %v291_v60, %v285_v22  ;;  %vm294_vm7 = vc.u32 %v292_v12, %v288_v21  ;;  %v2327_v2 = vadd.s32 4294967294, %v925_v36  ;;  %v245_v63 = vshrl.u32 %v3912_v17, %v2834_v42 }
 0x152   :  { %v295_v52 = vsel %vm294_vm7, 1, %v3881_v4  ;;  %v317_v7 = vsel %vm316_vm9, 1, %v3881_v4  ;;  %v289_v1 = vshrl.u32 %v284_v6, 16  ;;  %v309_v50 = vshrl.u32 %v305_v58, 16 }
 0x153   :  { %2374 = vset.pattern.permute.xlu1 %v3919_v34  ;;  %v297_v51 = vadd.s32 %v295_v52, %v293_v32  ;;  %v319_v8 = vadd.s32 %v317_v7, %v315_v10  ;;  %v2315_v23 = vadd.s32 4294967294, %v181_v40  ;;  %v265_v20 = vsel %vm261_vm3, %v245_v63, %v2861_v45 }
 0x154   :  { %1470 = vperm.xlu1 %2374, %v2444_v0   ;;  %v267_v47 = vsel %vm263_vm5, %v2863_v54, %v266_v13  ;;  %v2330_v53 = vadd.s32 4294967294, %v1079_v55  ;;  %v311_v22 = vshrl.u32 %v306_v14, 16  ;;  %v2929_v21 = vadd.s32 %v314_v35, %v310_v31 }
 0x155   :  { %v298_v15 = vadd.s32 %v297_v51, %v287_v56  ;;  %v320_v42 = vadd.s32 %v319_v8, %v309_v50  ;;  %vm2328_vm10 = vcmp.lt.s32.totalorder %v2327_v2, 0  ;;  %v268_v6 = vsel %vm262_vm6, %v265_v20, %v267_v47 }
 0x156   :  { %vm2316_vm11 = vcmp.lt.s32.totalorder %v2315_v23, 0  ;;  %vm2331_vm13 = vcmp.lt.s32.totalorder %v2330_v53, 0  ;;  %v928_v54 = vsel %vm2328_vm10, 0, %v2327_v2  ;;  %v322_v14 = vmul.u32 %v2878_v38, %v268_v6 }
 0x157   :  { %v2927_v36 = vadd.s32 %v298_v15, %v289_v1  ;;  %v321_v58 = vadd.s32 %v320_v42, %v311_v22  ;;  %v184_v12 = vsel %vm2316_vm11, 0, %v2315_v23  ;;  %v1082_v55 = vsel %vm2331_vm13, 0, %v2330_v53 }
 0x158   :  { %v933_v9 = vsub.s32 4294967266, %v928_v54  ;;  %v189_v31 = vsub.s32 4294967266, %v184_v12  ;;  %v1087_v32 = vsub.s32 4294967266, %v1082_v55  ;;  %v929_v61 = vsub.s32 32, %v928_v54 }
 0x159   :  { %vm324_vm12 = vc.u32 %v2927_v36, %v2929_v21  ;;  %v325_v45 = vadd.s32 1, %v321_v58  ;;  %v185_v56 = vsub.s32 32, %v184_v12  ;;  %v913_v38 = vadd.s32 %v2772_v57, %v2763_v48 }
 0x15a   :  { %v190_v40 = vadd.s32 127, %v189_v31  ;;  %v1088_v52 = vadd.s32 127, %v1087_v32  ;;  %v1083_v2 = vsub.s32 32, %v1082_v55  ;;  %v169_v63 = vadd.s32 %v2815_v62, %v2810_v11 }
 0x15b   :  { %v326_v34 = vsel %vm324_vm12, %v325_v45, %v321_v58  ;;  %v1067_v15 = vadd.s32 %v2784_v33, %v2776_v39  ;;  %v931_v8 = vshrl.u32 %v913_v38, %v929_v61  ;;  %v930_v57 = vshll.u32 %v2868_v19, %v928_v54 }
 0x15c   :  { %2376 = vset.pattern.permute.xlu1 %v3881_v4  ;;  %v327_v60 = vadd.s32 %v326_v34, %v322_v14  ;;  %v191_v7 = vshll.u32 %v190_v40, 23  ;;  %v1089_v50 = vshll.u32 %v1088_v52, 23  ;;  %v187_v23 = vshrl.u32 %v169_v63, %v185_v56 }
 0x15d   :  { %757 = vperm.xlu1 %2376, %v2444_v0   ;;  %v934_v0 = vadd.s32 127, %v933_v9  ;;  %v1085_v47 = vshrl.u32 %v1067_v15, %v1083_v2  ;;  %v186_v11 = vshll.u32 %v2888_v43, %v184_v12  ;;  %v1084_v22 = vshll.u32 %v2871_v18, %v1082_v55 }
 0x15e   :  { %v328_v3 = vadd.s32 536870912, %v327_v60  ;;  %v192_v62 = vor.u32 4788187, %v191_v7  ;;  %v1090_v42 = vor.u32 4788187, %v1089_v50  ;;  %v932_v58 = vor.u32 %v931_v8, %v930_v57 }
 0x15f   :  { %v935_v10 = vshll.u32 %v934_v0, 23  ;;  %v188_v45 = vor.u32 %v187_v23, %v186_v11  ;;  %v1086_v39 = vor.u32 %v1085_v47, %v1084_v22  ;;  %vm821_vm4 = vcmp.lt.s32.totalorder %v2475_v29, 0 }
 0x160   :  { %v2938_v35 = vshrl.u32 %v328_v3, 30  ;;  %v193_v14 = vand.u32 2147483647, %v192_v62  ;;  %v1091_v34 = vand.u32 2147483647, %v1090_v42  ;;  %vm77_vm5 = vcmp.lt.s32.totalorder %v2506_v5, 0 }
 0x161   :  { %v936_v53 = vor.u32 4788187, %v935_v10  ;;  %v195_v9 = vcvt.s32.f32 %v188_v45  ;;  %v1093_v31 = vcvt.s32.f32 %v1086_v39  ;;  %vm975_vm6 = vcmp.lt.s32.totalorder %v2478_v30, 0 }
 0x162   :  { %v330_v13 = vshll.u32 %v2938_v35, 30  ;;  %v3920_v56 = vand.u32 2147483647, %v2475_v29  ;;  %v3923_v10 = vand.u32 2147483647, %v2506_v5  ;;  %v323_v63 = vadd.s32 %v2929_v21, %v2927_v36 }
 0x163   :  { %v937_v33 = vand.u32 2147483647, %v936_v53  ;;  %v196_v54 = vmul.f32 %v195_v9, %v193_v14  ;;  %v1094_v32 = vmul.f32 %v1093_v31, %v1091_v34  ;;  %v3926_v15 = vand.u32 2147483647, %v2478_v30  ;;  %v45_v34 = vpop.permute.xlu0 %44 }
 0x164   :  { %v2941_v51 = vsub.s32 %v327_v60, %v330_v13  ;;  %v939_v60 = vcvt.s32.f32 %v932_v58  ;;  %vm2966_vm14 = vcmp.le.f32.partialorder %v3920_v56, 0.7853982  ;;  %vm2972_vm15 = vcmp.le.f32.partialorder %v3923_v10, 0.7853982 }
 0x165   :  { %v197_v0 = vxor.u32 2147483648, %v196_v54  ;;  %v1095_v18 = vxor.u32 2147483648, %v1094_v32  ;;  %vm2985_vm0 = vcmp.le.f32.partialorder %v3926_v15, 0.7853982  ;;  %vm231_vm1 = vcmp.lt.s32.totalorder %v2650_v24, 0 }
 0x166   :  { %vm332_vm2 = vcmp.lt.s32.totalorder %v2941_v51, 0  ;;  %v333_v1 = vsub.s32 0, %v2941_v51  ;;  %v940_v19 = vmul.f32 %v939_v60, %v937_v33  ;;  %vm3026_vm7 = vcmp.le.f32.partialorder %v229_v16, 0.7853982 }
 0x167   :  { %v198_v13 = vsel %vm77_vm5, %v197_v0, %v196_v54  ;;  %v1096_v61 = vsel %vm975_vm6, %v1095_v18, %v1094_v32  ;;  %v48_v54 = vmul.f32 %v45_v34, %v2472_v27  ;;  %v943_v32 = vsub.s32 4, %v2829_v49 }
 0x168   :  { %v334_v20 = vsel %vm332_vm2, %v333_v1, %v2941_v51  ;;  %v941_v12 = vxor.u32 2147483648, %v940_v19  ;;  %v2992_v8 = vsel %vm2972_vm15, %v2506_v5, %v198_v13  ;;  %v2997_v36 = vsel %vm2985_vm0, %v2478_v30, %v1096_v61 }
 0x169   :  { %v335_v48 = vclz %v334_v20  ;;  %v203_v20 = vmul.f32 %v2992_v8, %v2992_v8  ;;  %v3008_v57 = vmul.f32 %v2997_v36, %v2997_v36  ;;  %v3030_v56 = vclamps-f32 %v48_v54, 30.0 }
 0x16a   :  { %v942_v40 = vsel %vm821_vm4, %v941_v12, %v940_v19  ;;  %vm218_vm2 = vweird.f32 %v2506_v5 }
 0x16b   :  { %v2318_v6 = vadd.s32 4294967294, %v335_v48  ;;  %v2981_v1 = vsel %vm2966_vm14, %v2475_v29, %v942_v40  ;;  %v211_v62 = vmul.f32 -0.00019511016, %v203_v20  ;;  %v1109_v42 = vmul.f32 -0.00019511016, %v3008_v57 }
 0x16c   :  { %v3001_v23 = vmul.f32 %v2981_v1, %v2981_v1  ;;  %v204_v14 = vmul.f32 -0.001358992, %v203_v20 }
 0x16d   :  { %vm2319_vm3 = vcmp.lt.s32.totalorder %v2318_v6, 0  ;;  %v212_v45 = vadd.f32 0.008332121, %v211_v62  ;;  %v1110_v33 = vadd.f32 0.008332121, %v1109_v42  ;;  %v62_v62 = vsub.f32 0.0, %v3030_v56 }
 0x16e   :  { %v338_v3 = vsel %vm2319_vm3, 0, %v2318_v6  ;;  %v955_v11 = vmul.f32 -0.00019511016, %v3001_v23  ;;  %v205_v19 = vadd.f32 0.041655596, %v204_v14 }
 0x16f   :  { %v343_v43 = vsub.s32 4294967266, %v338_v3  ;;  %v339_v52 = vsub.s32 32, %v338_v3  ;;  %v340_v47 = vshll.u32 %v2941_v51, %v338_v3  ;;  %v213_v60 = vmul.f32 %v212_v45, %v203_v20 }
 0x170   :  { %v956_v58 = vadd.f32 0.008332121, %v955_v11  ;;  %v1111_v31 = vmul.f32 %v1110_v33, %v3008_v57  ;;  %v47_v3 = vmul.f32 %v45_v34, %v2470_v26  ;;  %v206_v13 = vmul.f32 %v205_v19, %v203_v20 }
 0x171   :  { %v344_v55 = vadd.s32 127, %v343_v43  ;;  %v341_v21 = vshrl.u32 %v323_v63, %v339_v52  ;;  %v214_v12 = vadd.f32 -0.16666654, %v213_v60  ;;  %v1097_v52 = vsub.s32 4, %v2832_v25 }
 0x172   :  { %v957_v51 = vmul.f32 %v956_v58, %v3001_v23  ;;  %v1112_v18 = vadd.f32 -0.16666654, %v1111_v31  ;;  %v3021_v40 = vclamps-f32 %v47_v3, 30.0  ;;  %v944_v63 = vsel %vm821_vm4, %v943_v32, %v2829_v49 }
 0x173   :  { %v345_v7 = vshll.u32 %v344_v55, 23  ;;  %v342_v53 = vor.u32 %v341_v21, %v340_v47  ;;  %v199_v55 = vsub.s32 4, %v2842_v59  ;;  %v215_v15 = vmul.f32 %v214_v12, %v203_v20 }
 0x174   :  { %v958_v43 = vadd.f32 -0.16666654, %v957_v51  ;;  %v1113_v21 = vmul.f32 %v1112_v18, %v3008_v57  ;;  %v61_v47 = vsub.f32 0.0, %v3021_v40  ;;  %v353_v11 = vsub.s32 4, %v2938_v35 }
 0x175   :  { %v346_v48 = vor.u32 4788187, %v345_v7  ;;  %v349_v6 = vcvt.s32.f32 %v342_v53  ;;  %v200_v16 = vsel %vm77_vm5, %v199_v55, %v2842_v59  ;;  %v1098_v53 = vsel %vm975_vm6, %v1097_v52, %v2832_v25 }
 0x176   :  { %v959_v7 = vmul.f32 %v958_v43, %v3001_v23  ;;  %v57_v59 = vmul.f32 1.442695, %v3021_v40  ;;  %v216_v58 = vadd.f32 1.0, %v215_v15  ;;  %v59_v25 = vmul.f32 1.442695, %v3030_v56 }
 0x177   :  { %v347_v22 = vand.u32 2147483647, %v346_v48  ;;  %v207_v48 = vadd.f32 -0.4999988, %v206_v13  ;;  %v1100_v45 = vsel %vm2985_vm0, 0, %v1098_v53  ;;  %v354_v38 = vsel %vm231_vm1, %v353_v11, %v2938_v35 }
 0x178   :  { %v960_v42 = vadd.f32 1.0, %v959_v7  ;;  %v63_v33 = vmul.f32 1.442695, %v61_v47  ;;  %v65_v51 = vmul.f32 1.442695, %v62_v62  ;;  %2381 = vpow2.f32 %v57_v59 }
 0x179   :  { %v350_v39 = vmul.f32 %v349_v6, %v347_v22  ;;  %v946_v22 = vsel %vm2966_vm14, 0, %v944_v63  ;;  %v202_v6 = vsel %vm2972_vm15, 0, %v200_v16  ;;  %v208_v14 = vmul.f32 %v207_v48, %v203_v20 }
 0x17a   :  { %v1271_v2 = vadd.s32 3, %v946_v22  ;;  %v3069_v31 = vmul.f32 %v960_v42, %v2981_v1  ;;  %v1426_v50 = vadd.s32 3, %v1100_v45  ;;  %v217_v3 = vmul.f32 %v216_v58, %v2992_v8 }
 0x17b   :  { %v351_v9 = vxor.u32 2147483648, %v350_v39  ;;  %2383 = vpow2.f32 %v59_v25  ;;  %v356_v35 = vsel %vm3026_vm7, 0, %v354_v38  ;;  %v209_v19 = vadd.f32 1.0, %v208_v14 }
 0x17c   :  { %2385 = vpow2.f32 %v63_v33  ;;  %v219_v54 = vand.u32 3, %v202_v6  ;;  %v3077_v12 = vand.u32 3, %v946_v22  ;;  %v3079_v1 = vand.u32 3, %v1100_v45 }
 0x17d   :  { %v352_v0 = vsel %vm231_vm1, %v351_v9, %v350_v39  ;;  %v1114_v39 = vadd.f32 1.0, %v1113_v21  ;;  %v527_v9 = vadd.s32 3, %v202_v6  ;;  %2387 = vpow2.f32 %v65_v51 }
 0x17e   :  { %v3035_v10 = vsel %vm3026_vm7, %v2650_v24, %v352_v0  ;;  %v3081_v0 = vand.u32 3, %v1271_v2  ;;  %v222_v55 = vxor.u32 2147483648, %v217_v3  ;;  %v682_v13 = vadd.s32 3, %v356_v35  ;;  %v2382_v52 = vpop.eup %2381 }
 0x17f   :  { %v3052_v49 = vmul.f32 %v3035_v10, %v3035_v10  ;;  %v3073_v20 = vmul.f32 %v1114_v39, %v2997_v36  ;;  %v528_v8 = vand.u32 3, %v527_v9  ;;  %v3084_v36 = vand.u32 3, %v1426_v50 }
 0x180   :  { %v53_v63 = vand.u32 2147483647, %v3021_v40  ;;  %v54_v7 = vand.u32 2147483647, %v3030_v56  ;;  %v225_v15 = vxor.u32 2147483648, %v209_v19  ;;  %vm220_vm8 = vcmp.lt.s32.totalorder %v219_v54, 2 }
 0x181   :  { %v365_v34 = vmul.f32 -0.00019511016, %v3052_v49  ;;  %v358_v60 = vmul.f32 -0.001358992, %v3052_v49  ;;  %3931 = vst [vmem:[#allocation3_spill] sm:$0xff] %v3073_v20  ;;  %v2384_v21 = vpop.eup %2383  ;;  %vm221_vm9 = vcmp.eq.s32.totalorder %v219_v54, 0 }
 0x182   :  { %3932 = vst [vmem:[#allocation4_spill] sm:$0xff] %v3084_v36  ;;  %v2386_v48 = vpop.eup %2385  ;;  %vm224_vm10 = vcmp.eq.s32.totalorder %v219_v54, 2  ;;  %vm529_vm11 = vcmp.lt.s32.totalorder %v528_v8, 2  ;;  %vm530_vm12 = vcmp.eq.s32.totalorder %v528_v8, 0  ;;  %vm533_vm13 = vcmp.eq.s32.totalorder %v528_v8, 2 }
 0x183   :  { %v366_v32 = vadd.f32 0.008332121, %v365_v34  ;;  %v359_v43 = vadd.f32 0.041655596, %v358_v60  ;;  %v2388_v53 = vpop.eup %2387  ;;  %v3091_v11 = vand.u32 3, %v356_v35  ;;  %v3093_v62 = vand.u32 3, %v682_v13 }
 0x184   :  { %v223_v40 = vsel %vm221_vm9, %v209_v19, %v222_v55  ;;  %v948_v56 = vmul.f32 -0.001358992, %v3001_v23  ;;  %v3097_v22 = vsub.f32 30.0, %v53_v63  ;;  %v3099_v59 = vsub.f32 30.0, %v54_v7 }
 0x185   :  { %v367_v16 = vmul.f32 %v366_v32, %v3052_v49  ;;  %v360_v47 = vmul.f32 %v359_v43, %v3052_v49  ;;  %v226_v42 = vsel %vm224_vm10, %v225_v15, %v217_v3  ;;  %v1102_v58 = vmul.f32 -0.001358992, %v3008_v57 }
 0x186   :  { %v71_v14 = vsub.f32 %v2382_v52, %v2386_v48  ;;  %v67_v38 = vadd.f32 %v2386_v48, %v2382_v52  ;;  %v68_v34 = vadd.f32 %v2388_v53, %v2384_v21  ;;  %v535_v51 = vsel %vm533_vm13, %v225_v15, %v217_v3 }
 0x187   :  { %v368_v25 = vadd.f32 -0.16666654, %v367_v16  ;;  %v361_v45 = vadd.f32 -0.4999988, %v360_v47  ;;  %v227_v60 = vsel %vm220_vm8, %v223_v40, %v226_v42  ;;  %v949_v50 = vadd.f32 0.041655596, %v948_v56 }
 0x188   :  { %v532_v35 = vsel %vm530_vm12, %v209_v19, %v222_v55  ;;  %v1103_v13 = vadd.f32 0.041655596, %v1102_v58  ;;  %v72_v54 = vsub.f32 %v2384_v21, %v2388_v53  ;;  %v3119_v15 = vmul.f32 0.5, %v67_v38 }
 0x189   :  { %v369_v63 = vmul.f32 %v368_v25, %v3052_v49  ;;  %v362_v52 = vmul.f32 %v361_v45, %v3052_v49  ;;  %v3123_v55 = vmul.f32 0.5, %v71_v14  ;;  %v536_v47 = vsel %vm529_vm11, %v532_v35, %v535_v51 }
 0x18a   :  { %v228_v49 = vsel %vm218_vm2, nan, %v227_v60  ;;  %v950_v42 = vmul.f32 %v949_v50, %v3001_v23  ;;  %v1104_v21 = vmul.f32 %v1103_v13, %v3008_v57  ;;  %v3134_v45 = vmul.f32 0.5, %v72_v54 }
 0x18b   :  { %v370_v53 = vadd.f32 1.0, %v369_v63  ;;  %v3132_v58 = vadd.f32 1.0, %v362_v52  ;;  %v3138_v8 = vsel %vm218_vm2, nan, %v536_v47  ;;  %v3141_v51 = vmul.f32 %v228_v49, %v3119_v15 }
 0x18c   :  { %3935 = vst [vmem:[#allocation7_spill] sm:$0xff] %v3134_v45  ;;  %v3144_v60 = vmul.f32 %v228_v49, %v3123_v55  ;;  %v3148_v35 = vadd.f32 -0.4999988, %v950_v42  ;;  %v3937_v45 = vmov 0   ;;  %v3938_v36 = vmov 920167782  }
 0x18d   :  { %3936 = vst [vmem:[#allocation8_spill] sm:$0xff] %v3141_v51  ;;  %v3153_v5 = vmul.f32 %v370_v53, %v3035_v10 }
 0x1ab   :  { %v1646_v6 = vpop.permute.xlu1 %1645 }
 0x1ac   :  { %v3103_v39 = vmul.f32 %v1646_v6, %v2470_v26  ;;  %v3106_v33 = vmul.f32 %v1646_v6, %v2472_v27  ;;  %v3130_v6 = vmul.f32 0.5, %v68_v34 }
 0x1ae   :  { %3933 = vst [vmem:[#allocation5_spill] sm:$0xff] %v3103_v39  ;;  %v3878_v2 = vand.u32 2147483647, %v3103_v39  ;;  %v1653_v9 = vand.u32 2139095040, %v3103_v39  ;;  %v3877_v32 = vand.u32 2147483647, %v3106_v33 }
 0x1af   :  { %3934 = vst [vmem:[#allocation6_spill] sm:$0xff] %v3106_v33  ;;  %v1807_v43 = vand.u32 2139095040, %v3106_v33 }
 0x1b0   :  { %v1654_v7 = vshrl.u32 %v1653_v9, 23  ;;  %v1657_v3 = vand.u32 8388607, %v3878_v2  ;;  %v1811_v19 = vand.u32 8388607, %v3877_v32 }
 0x1b1   :  { %v1808_v16 = vshrl.u32 %v1807_v43, 23  ;;  %v3150_v43 = vadd.f32 -0.4999988, %v1104_v21 }
 0x1b2   :  { %v2338_v48 = vadd.s32 4294967169, %v1654_v7  ;;  %v1658_v40 = vor.u32 8388608, %v1657_v3  ;;  %v1812_v14 = vor.u32 8388608, %v1811_v19 }
 0x1b3   :  { %v2341_v56 = vadd.s32 4294967169, %v1808_v16 }
 0x1b4   :  { %v1660_v25 = vadd.s32 1, %v2338_v48  ;;  %v3146_v34 = vshll.u32 %v1658_v40, 8  ;;  %v791_v9 = vpop.permute.xlu1 %790  ;;  %v3156_v7 = vshll.u32 %v1812_v14, 8 }
 0x1b5   :  { %v1814_v38 = vadd.s32 1, %v2341_v56  ;;  %v3159_v3 = vmul.f32 %v791_v9, %v2470_v26  ;;  %v3167_v10 = vmul.f32 %v791_v9, %v2472_v27 }
 0x1b6   :  { %vm1661_vm3 = vcmp.gt.s32.totalorder %v1660_v25, 0  ;;  %v1699_v47 = vand.u32 65535, %v3146_v34  ;;  %v1700_v26 = vshrl.u32 %v3146_v34, 16 }
 0x1b7   :  { %v1662_v50 = vsel %vm1661_vm3, %v1660_v25, 0  ;;  %vm1815_vm4 = vcmp.gt.s32.totalorder %v1814_v38, 0 }
 0x1b8   :  { %v1664_v63 = vand.u32 31, %v1662_v50  ;;  %v1816_v52 = vsel %vm1815_vm4, %v1814_v38, 0  ;;  %v3169_v40 = vshrl.u32 %v1662_v50, 5  ;;  %vm375_vm4 = vcmp.eq.s32.totalorder %v3091_v11, 0 }
 0x1b9   :  { %v3164_v48 = vand.u32 31, %v1816_v52 }
 0x1ba   :  { %v1665_v19 = vsub.s32 32, %v1664_v63  ;;  %v1667_v49 = vshll.u32 %v3912_v17, %v1664_v63  ;;  %v1670_v56 = vshll.u32 %v3915_v46, %v1664_v63  ;;  %v1673_v53 = vshll.u32 %v3916_v41, %v1664_v63 }
 0x1bb   :  { %v1676_v14 = vshll.u32 %v3917_v28, %v1664_v63  ;;  %v1679_v38 = vshll.u32 %v3879_v44, %v1664_v63  ;;  %v3183_v61 = vsub.s32 32, %v3164_v48  ;;  %vm1682_vm5 = vcmp.lt.s32.totalorder %v3169_v40, 1 }
 0x1bc   :  { %v1668_v42 = vshrl.u32 %v3915_v46, %v1665_v19  ;;  %v1671_v21 = vshrl.u32 %v3916_v41, %v1665_v19  ;;  %v1674_v25 = vshrl.u32 %v3917_v28, %v1665_v19  ;;  %v1677_v27 = vshrl.u32 %v3879_v44, %v1665_v19 }
 0x1bd   :  { %v1680_v9 = vshrl.u32 %v3918_v37, %v1665_v19  ;;  %vm1683_vm6 = vcmp.lt.s32.totalorder %v3169_v40, 2  ;;  %v1666_v16 = vshrl.u32 %v3912_v17, %v1665_v19  ;;  %vm1685_vm14 = vcmp.lt.s32.totalorder %v3169_v40, 4 }
 0x1be   :  { %v1669_v50 = vor.u32 %v1668_v42, %v1667_v49  ;;  %v1672_v32 = vor.u32 %v1671_v21, %v1670_v56  ;;  %v1675_v2 = vor.u32 %v1674_v25, %v1673_v53  ;;  %v1678_v18 = vor.u32 %v1677_v27, %v1676_v14 }
 0x1bf   :  { %v1681_v13 = vor.u32 %v1680_v9, %v1679_v38  ;;  %vm1684_vm15 = vcmp.lt.s32.totalorder %v3169_v40, 3  ;;  %v1821_v21 = vshll.u32 %v3912_v17, %v3164_v48  ;;  %v1822_v14 = vshrl.u32 %v3915_v46, %v3183_v61 }
 0x1c0   :  { %v1690_v63 = vsel %vm1682_vm5, %v1669_v50, %v1672_v32  ;;  %v1694_v49 = vsel %vm1682_vm5, %v1672_v32, %v1675_v2  ;;  %v1691_v56 = vsel %vm1685_vm14, %v1678_v18, 920167782  ;;  %v1687_v53 = vsel %vm1685_vm14, %v1675_v2, 2102212464 }
 0x1c1   :  { %v1695_v42 = vsel %vm1685_vm14, %v1681_v13, 1326507024  ;;  %v1692_v25 = vsel %vm1684_vm15, %v1675_v2, %v1691_v56  ;;  %v1824_v13 = vshll.u32 %v3915_v46, %v3164_v48  ;;  %v1825_v9 = vshrl.u32 %v3916_v41, %v3183_v61 }
 0x1c2   :  { %v1696_v19 = vsel %vm1684_vm15, %v1678_v18, %v1695_v42  ;;  %v1693_v27 = vsel %vm1683_vm6, %v1690_v63, %v1692_v25  ;;  %v1686_v18 = vsel %vm1682_vm5, %v1666_v16, %v1669_v50  ;;  %v1688_v42 = vsel %vm1684_vm15, %v1672_v32, %v1687_v53 }
 0x1c3   :  { %v1697_v38 = vsel %vm1683_vm6, %v1694_v49, %v1696_v19  ;;  %v1723_v56 = vand.u32 65535, %v1693_v27  ;;  %v1724_v44 = vshrl.u32 %v1693_v27, 16  ;;  %v3214_v63 = vshrl.u32 %v1816_v52, 5 }
 0x1c4   :  { %v1701_v54 = vand.u32 65535, %v1697_v38  ;;  %v1702_v2 = vshrl.u32 %v1697_v38, 16  ;;  %v3216_v25 = vor.u32 %v1822_v14, %v1821_v21  ;;  %v3218_v46 = vor.u32 %v1825_v9, %v1824_v13 }
 0x1c5   :  { %v1828_v4 = vshrl.u32 %v3917_v28, %v3183_v61  ;;  %v1726_v51 = vmul.u32 %v1724_v44, %v1699_v47  ;;  %v1727_v27 = vmul.u32 %v1723_v56, %v1700_v26  ;;  %v1827_v16 = vshll.u32 %v3916_v41, %v3164_v48 }
 0x1c6   :  { %v1704_v49 = vmul.u32 %v1702_v2, %v1699_v47  ;;  %v1705_v19 = vmul.u32 %v1701_v54, %v1700_v26  ;;  %v1703_v38 = vmul.u32 %v1701_v54, %v1699_v47  ;;  %v1706_v50 = vmul.u32 %v1702_v2, %v1700_v26 }
 0x1c7   :  { %v1725_v32 = vmul.u32 %v1723_v56, %v1699_v47  ;;  %v1728_v52 = vmul.u32 %v1724_v44, %v1700_v26  ;;  %v1729_v39 = vshll.u32 %v1726_v51, 16  ;;  %v1731_v9 = vshll.u32 %v1727_v27, 16 }
 0x1c8   :  { %v1707_v33 = vshll.u32 %v1704_v49, 16  ;;  %v1708_v53 = vshrl.u32 %v1704_v49, 16  ;;  %v1709_v21 = vshll.u32 %v1705_v19, 16  ;;  %v1710_v14 = vshrl.u32 %v1705_v19, 16 }
 0x1c9   :  { %v3224_v20 = vor.u32 %v1828_v4, %v1827_v16  ;;  %vm1733_vm1 = vc.u32 %v1725_v32, %v1729_v39  ;;  %v1735_v30 = vadd.s32 %v1729_v39, %v1725_v32  ;;  %v1831_v41 = vshrl.u32 %v3938_v36, %v3183_v61 }
 0x1ca   :  { %vm1711_vm0 = vc.u32 %v1703_v38, %v1707_v33  ;;  %v1713_v13 = vadd.s32 %v1707_v33, %v1703_v38  ;;  %v1734_v44 = vsel %vm1733_vm1, 1, %v3937_v45  ;;  %v1830_v47 = vshll.u32 %v3917_v28, %v3164_v48 }
 0x1cb   :  { %v1712_v54 = vsel %vm1711_vm0, 1, %v3937_v45  ;;  %v1736_v33 = vadd.s32 %v1734_v44, %v1728_v52  ;;  %vm1737_vm8 = vc.u32 %v1735_v30, %v1731_v9  ;;  %v1833_v4 = vshll.u32 %v3938_v36, %v3164_v48 }
 0x1cc   :  { %v1714_v2 = vadd.s32 %v1712_v54, %v1706_v50  ;;  %vm1715_vm7 = vc.u32 %v1713_v13, %v1709_v21  ;;  %v1738_v39 = vsel %vm1737_vm8, 1, %v3937_v45  ;;  %v1832_v49 = vor.u32 %v1831_v41, %v1830_v47 }
 0x1cd   :  { %v1716_v26 = vsel %vm1715_vm7, 1, %v3937_v45  ;;  %v1834_v19 = vshrl.u32 %v3918_v37, %v3183_v61  ;;  %v1730_v38 = vshrl.u32 %v1726_v51, 16  ;;  %v1732_v16 = vshrl.u32 %v1727_v27, 16 }
 0x1ce   :  { %v1718_v56 = vadd.s32 %v1716_v26, %v1714_v2  ;;  %v3238_v50 = vadd.s32 %v1735_v30, %v1731_v9  ;;  %v1740_v32 = vadd.s32 %v1738_v39, %v1736_v33  ;;  %vm1836_vm9 = vcmp.lt.s32.totalorder %v3214_v63, 1  ;;  %v3265_v9 = vpop.permute.xlu2 %736 }
 0x1cf   :  { %v1835_v21 = vor.u32 %v1834_v19, %v1833_v4  ;;  %vm1839_vm10 = vcmp.lt.s32.totalorder %v3214_v63, 4  ;;  %vm1838_vm11 = vcmp.lt.s32.totalorder %v3214_v63, 3  ;;  %v1844_v36 = vsel %vm1836_vm9, %v3216_v25, %v3218_v46 }
 0x1d0   :  { %v1719_v28 = vadd.s32 %v1718_v56, %v1708_v53  ;;  %v1741_v52 = vadd.s32 %v1740_v32, %v1730_v38  ;;  %v1845_v37 = vsel %vm1839_vm10, %v1832_v49, 920167782  ;;  %vm1837_vm12 = vcmp.lt.s32.totalorder %v3214_v63, 2 }
 0x1d1   :  { %v1846_v51 = vsel %vm1838_vm11, %v3224_v20, %v1845_v37  ;;  %v1848_v48 = vsel %vm1836_vm9, %v3218_v46, %v3224_v20  ;;  %v1689_v27 = vsel %vm1683_vm6, %v1686_v18, %v1688_v42  ;;  %v1853_v41 = vand.u32 65535, %v3156_v7 }
 0x1d2   :  { %v3249_v30 = vadd.s32 %v1719_v28, %v1710_v14  ;;  %v1742_v53 = vadd.s32 %v1741_v52, %v1732_v16  ;;  %v1847_v13 = vsel %vm1837_vm12, %v1844_v36, %v1846_v51  ;;  %v1849_v14 = vsel %vm1839_vm10, %v1835_v21, 1326507024 }
 0x1d3   :  { %v1850_v54 = vsel %vm1838_vm11, %v1832_v49, %v1849_v14  ;;  %v1877_v2 = vand.u32 65535, %v1847_v13  ;;  %v1854_v42 = vshrl.u32 %v3156_v7, 16  ;;  %v1878_v44 = vshrl.u32 %v1847_v13, 16 }
 0x1d4   :  { %vm1745_vm13 = vc.u32 %v3249_v30, %v3238_v50  ;;  %v1746_v40 = vadd.s32 1, %v1742_v53  ;;  %v1851_v18 = vsel %vm1837_vm12, %v1848_v48, %v1850_v54  ;;  %v1743_v47 = vmul.u32 %v3146_v34, %v1689_v27 }
 0x1d5   :  { %v1855_v26 = vand.u32 65535, %v1851_v18  ;;  %v1856_v33 = vshrl.u32 %v1851_v18, 16  ;;  %v3278_v4 = vmul.f32 %v3148_v35, %v3001_v23  ;;  %v1880_v39 = vmul.u32 %v1878_v44, %v1853_v41 }
 0x1d6   :  { %v1747_v56 = vsel %vm1745_vm13, %v1746_v40, %v1742_v53  ;;  %v3280_v49 = vmul.u32 %v1877_v2, %v1854_v42  ;;  %v3284_v19 = vmul.f32 %v3150_v43, %v3008_v57  ;;  %v3939_v34 = vsub.f32 0.0, %v3097_v22 }
 0x1d7   :  { %v1748_v38 = vadd.s32 %v1747_v56, %v1743_v47  ;;  %v1858_v16 = vmul.u32 %v1856_v33, %v1853_v41  ;;  %v1859_v32 = vmul.u32 %v1855_v26, %v1854_v42  ;;  %v1879_v21 = vmul.u32 %v1877_v2, %v1853_v41  ;;  %v3303_v2 = vpop.permute.xlu2 %1450 }
 0x1d8   :  { %v797_v28 = vmax.f32 %v3939_v34, %v3159_v3  ;;  %v1882_v52 = vmul.u32 %v1878_v44, %v1854_v42  ;;  %v1883_v36 = vshll.u32 %v1880_v39, 16  ;;  %v3940_v23 = vsub.f32 0.0, %v3099_v59 }
 0x1d9   :  { %v1749_v37 = vadd.s32 536870912, %v1748_v38  ;;  %v1857_v51 = vmul.u32 %v1855_v26, %v1853_v41  ;;  %v1860_v48 = vmul.u32 %v1856_v33, %v1854_v42  ;;  %v1861_v27 = vshll.u32 %v1858_v16, 16 }
 0x1da   :  { %v798_v35 = vmax.f32 %v3940_v23, %v3167_v10  ;;  %v1863_v57 = vshll.u32 %v1859_v32, 16  ;;  %v1885_v43 = vshll.u32 %v3280_v49, 16  ;;  %vm1887_vm2 = vc.u32 %v1879_v21, %v1883_v36 }
 0x1db   :  { %v1889_v53 = vadd.s32 %v1883_v36, %v1879_v21  ;;  %v3293_v13 = vshrl.u32 %v1749_v37, 30  ;;  %vm1865_vm3 = vc.u32 %v1857_v51, %v1861_v27  ;;  %v1867_v3 = vadd.s32 %v1861_v27, %v1857_v51 }
 0x1dc   :  { %v1888_v14 = vsel %vm1887_vm2, 1, %v3937_v45  ;;  %vm378_vm5 = vcmp.eq.s32.totalorder %v3091_v11, 2  ;;  %vm685_vm6 = vcmp.eq.s32.totalorder %v3093_v62, 0  ;;  %v1841_v10 = vsel %vm1839_vm10, %v3224_v20, 2102212464 }
 0x1dd   :  { %v1866_v54 = vsel %vm1865_vm3, 1, %v3937_v45  ;;  %v1890_v41 = vadd.s32 %v1888_v14, %v1882_v52  ;;  %vm1891_vm14 = vc.u32 %v1889_v53, %v1885_v43  ;;  %v1751_v40 = vshll.u32 %v3293_v13, 30 }
 0x1de   :  { %v1868_v18 = vadd.s32 %v1866_v54, %v1860_v48  ;;  %vm1869_vm15 = vc.u32 %v1867_v3, %v1863_v57  ;;  %v799_v42 = vmin.f32 %v3097_v22, %v797_v28  ;;  %vm688_vm0 = vcmp.eq.s32.totalorder %v3093_v62, 2 }
 0x1df   :  { %v1820_v44 = vshrl.u32 %v3912_v17, %v3183_v61  ;;  %v1870_v47 = vsel %vm1869_vm15, 1, %v3937_v45  ;;  %v1892_v20 = vsel %vm1891_vm14, 1, %v3937_v45  ;;  %v800_v26 = vmin.f32 %v3099_v59, %v798_v35 }
 0x1e0   :  { %vm374_vm1 = vcmp.lt.s32.totalorder %v3091_v11, 2  ;;  %v3314_v33 = vsub.s32 %v1748_v38, %v1751_v40  ;;  %v1862_v56 = vshrl.u32 %v1858_v16, 16  ;;  %v1872_v34 = vadd.s32 %v1870_v47, %v1868_v18 }
 0x1e1   :  { %v1894_v21 = vadd.s32 %v1892_v20, %v1890_v41  ;;  %v376_v22 = vxor.u32 2147483648, %v3153_v5  ;;  %vm684_vm7 = vcmp.lt.s32.totalorder %v3093_v62, 2  ;;  %v1840_v17 = vsel %vm1836_vm9, %v1820_v44, %v3216_v25 }
 0x1e2   :  { %v1842_v61 = vsel %vm1838_vm11, %v3218_v46, %v1841_v10  ;;  %v1884_v59 = vshrl.u32 %v1880_v39, 16  ;;  %vm1753_vm8 = vcmp.lt.s32.totalorder %v3314_v33, 0  ;;  %v1754_v45 = vsub.s32 0, %v3314_v33 }
 0x1e3   :  { %v1873_v38 = vadd.s32 %v1872_v34, %v1862_v56  ;;  %v805_v16 = vsub.f32 0.0, %v799_v42  ;;  %v1864_v28 = vshrl.u32 %v1859_v32, 16  ;;  %v1886_v52 = vshrl.u32 %v3280_v49, 16  ;;  %v3335_v32 = vpop.permute.xlu2 %1476 }
 0x1e4   :  { %v1895_v36 = vadd.s32 %v1894_v21, %v1884_v59  ;;  %v806_v23 = vsub.f32 0.0, %v800_v26  ;;  %v1755_v35 = vsel %vm1753_vm8, %v1754_v45, %v3314_v33  ;;  %v1843_v25 = vsel %vm1837_vm12, %v1840_v17, %v1842_v61 }
 0x1e5   :  { %v3330_v37 = vadd.s32 %v1889_v53, %v1885_v43  ;;  %v801_v46 = vmul.f32 1.442695, %v799_v42  ;;  %vm372_vm9 = vweird.f32 %v2650_v24  ;;  %v1756_v39 = vclz %v1755_v35 }
 0x1e6   :  { %v3333_v51 = vadd.s32 %v1873_v38, %v1864_v28  ;;  %v1896_v48 = vadd.s32 %v1895_v36, %v1886_v52  ;;  %v803_v27 = vmul.f32 1.442695, %v800_v26  ;;  %v377_v49 = vsel %vm375_vm4, %v3132_v58, %v376_v22 }
 0x1e7   :  { %v3941_v63 = vxor.u32 2147483648, %v3132_v58  ;;  %v687_v43 = vsel %vm685_vm6, %v3132_v58, %v376_v22  ;;  %v807_v53 = vmul.f32 1.442695, %v805_v16  ;;  %v2339_v3 = vadd.s32 4294967294, %v1756_v39 }
 0x1e8   :  { %vm1899_vm10 = vc.u32 %v3333_v51, %v3330_v37  ;;  %v1900_v14 = vadd.s32 1, %v1896_v48  ;;  %v809_v10 = vmul.f32 1.442695, %v806_v23  ;;  %vm968_vm11 = vcmp.eq.s32.totalorder %v3077_v12, 2 }
 0x1e9   :  { %v380_v57 = vsel %vm378_vm5, %v3941_v63, %v3153_v5  ;;  %v3942_v54 = vmov %v3941_v63  ;;  %v1897_v40 = vmul.u32 %v3156_v7, %v1843_v25  ;;  %2389 = vpow2.f32 %v801_v46  ;;  %v3944_v25 = vld [vmem:[#allocation4_spill] sm:$0xff]  ;;  %v3945_v46 = vld [vmem:[#allocation2_spill] sm:$0xff] }
 0x1ea   :  { %v690_v41 = vsel %vm688_vm0, %v3942_v54, %v3153_v5  ;;  %v3358_v18 = vadd.f32 1.0, %v3278_v4  ;;  %v381_v42 = vsel %vm374_vm1, %v377_v49, %v380_v57  ;;  %vm2340_vm12 = vcmp.lt.s32.totalorder %v2339_v3, 0 }
 0x1eb   :  { %v1901_v44 = vsel %vm1899_vm10, %v1900_v14, %v1896_v48  ;;  %2391 = vpow2.f32 %v803_v27  ;;  %vm965_vm13 = vcmp.eq.s32.totalorder %v3077_v12, 0  ;;  %v691_v58 = vsel %vm684_vm7, %v687_v43, %v690_v41  ;;  %v3396_v38 = vpop.permute.xlu2 %764  ;;  %v3946_v48 = vld [vmem:[#allocation7_spill] sm:$0xff] }
 0x1ec   :  { %v1759_v47 = vsel %vm2340_vm12, 0, %v2339_v3  ;;  %v1902_v20 = vadd.s32 %v1901_v44, %v1897_v40  ;;  %2393 = vpow2.f32 %v807_v53  ;;  %v1744_v5 = vadd.s32 %v3238_v50, %v3249_v30  ;;  %v3948_v44 = vld [vmem:[#allocation3_spill] sm:$0xff] }
 0x1ed   :  { %v1760_v7 = vsub.s32 32, %v1759_v47  ;;  %v1764_v4 = vsub.s32 4294967266, %v1759_v47  ;;  %2395 = vpow2.f32 %v809_v10  ;;  %v695_v11 = vsub.f32 0.0, %v3138_v8 }
 0x1ee   :  { %v1903_v26 = vadd.s32 536870912, %v1902_v20  ;;  %vm964_vm2 = vcmp.lt.s32.totalorder %v3077_v12, 2  ;;  %v969_v56 = vxor.u32 2147483648, %v3358_v18  ;;  %v3371_v34 = vadd.f32 1.0, %v3284_v19 }
 0x1ef   :  { %vm1119_vm3 = vcmp.eq.s32.totalorder %v3079_v1, 0  ;;  %v3376_v62 = vmul.f32 %v3138_v8, %v3119_v15  ;;  %v1761_v50 = vshll.u32 %v3314_v33, %v1759_v47  ;;  %v1762_v30 = vshrl.u32 %v1744_v5, %v1760_v7  ;;  %v2390_v22 = vpop.eup %2389 }
 0x1f0   :  { %v1765_v21 = vadd.s32 127, %v1764_v4  ;;  %vm1122_vm4 = vcmp.eq.s32.totalorder %v3079_v1, 2  ;;  %v382_v17 = vsel %vm372_vm9, nan, %v381_v42  ;;  %v692_v19 = vsel %vm372_vm9, nan, %v691_v58 }
 0x1f1   :  { %v3384_v61 = vshrl.u32 %v1903_v26, 30  ;;  %vm1274_vm5 = vcmp.eq.s32.totalorder %v3081_v0, 0  ;;  %v2392_v59 = vpop.eup %2391  ;;  %vm962_vm6 = vweird.f32 %v2475_v29  ;;  %v3389_v15 = vsub.f32 0.0, %v3144_v60 }
 0x1f2   :  { %v1763_v8 = vor.u32 %v1762_v30, %v1761_v50  ;;  %v1766_v33 = vshll.u32 %v1765_v21, 23  ;;  %vm1118_vm14 = vcmp.lt.s32.totalorder %v3079_v1, 2  ;;  %vm1277_vm15 = vcmp.eq.s32.totalorder %v3081_v0, 2  ;;  %v2394_v45 = vpop.eup %2393  ;;  %v3951_v30 = vld [vmem:[#allocation5_spill] sm:$0xff] }
 0x1f3   :  { %3943 = vst [vmem:[#allocation9_spill] sm:$0xff] %v3384_v61  ;;  %v3394_v24 = vmul.f32 %v695_v11, %v3123_v55  ;;  %v1905_v16 = vshll.u32 %v3384_v61, 30  ;;  %v970_v28 = vsel %vm968_vm11, %v969_v56, %v3069_v31  ;;  %v1123_v60 = vxor.u32 2147483648, %v3371_v34  ;;  %v2396_v52 = vpop.eup %2395 }
 0x1f4   :  { %v3404_v36 = vmul.f32 %v382_v17, %v3130_v6  ;;  %v696_v23 = vsub.f32 0.0, %v692_v19  ;;  %v1767_v35 = vor.u32 4788187, %v1766_v33  ;;  %vm1273_vm0 = vcmp.lt.s32.totalorder %v3081_v0, 2 }
 0x1f5   :  { %v1279_v55 = vsel %vm1277_vm15, %v969_v56, %v3069_v31  ;;  %vm1429_vm1 = vcmp.eq.s32.totalorder %v3944_v25, 0  ;;  %vm1116_vm7 = vweird.f32 %v3945_v46  ;;  %v3411_v39 = vmul.f32 %v692_v19, %v3130_v6 }
 0x1f6   :  { %v702_v27 = vmul.f32 %v382_v17, %v3946_v48  ;;  %v3414_v49 = vsub.s32 %v1902_v20, %v1905_v16  ;;  %v3947_v63 = vxor.u32 2147483648, %v3069_v31  ;;  %vm1432_vm8 = vcmp.eq.s32.totalorder %v3944_v25, 2 }
 0x1f7   :  { %v3424_v43 = vmul.f32 %v3396_v38, %v3376_v62  ;;  %v1768_v53 = vand.u32 2147483647, %v1767_v35  ;;  %v1770_v3 = vcvt.s32.f32 %v1763_v8  ;;  %v815_v6 = vsub.f32 %v2390_v22, %v2394_v45  ;;  %v744_v35 = vpop.permute.xlu1 %743 }
 0x1f8   :  { %v967_v57 = vsel %vm965_vm13, %v3358_v18, %v3947_v63  ;;  %v3428_v14 = vmul.f32 %v3396_v38, %v3389_v15  ;;  %vm1907_vm9 = vcmp.lt.s32.totalorder %v3414_v49, 0  ;;  %v1908_v10 = vsub.s32 0, %v3414_v49 }
 0x1f9   :  { %v816_v54 = vsub.f32 %v2392_v59, %v2396_v52  ;;  %v3433_v41 = vmul.f32 %v696_v23, %v3946_v48  ;;  %v1771_v40 = vmul.f32 %v1770_v3, %v1768_v53  ;;  %v971_v42 = vsel %vm964_vm2, %v967_v57, %v970_v28 }
 0x1fa   :  { %v3949_v58 = vxor.u32 2147483648, %v3948_v44  ;;  %vm1428_vm10 = vcmp.lt.s32.totalorder %v3944_v25, 2  ;;  %v3443_v20 = vsub.f32 0.0, %v702_v27  ;;  %v3447_v5 = vmul.f32 %v3396_v38, %v3411_v39 }
 0x1fb   :  { %v1909_v7 = vsel %vm1907_vm9, %v1908_v10, %v3414_v49  ;;  %v1124_v12 = vsel %vm1122_vm4, %v1123_v60, %v3948_v44  ;;  %v1772_v4 = vxor.u32 2147483648, %v1771_v40  ;;  %v3453_v26 = vmul.f32 0.5, %v815_v6 }
 0x1fc   :  { %v1121_v47 = vsel %vm1119_vm3, %v3371_v34, %v3949_v58  ;;  %v1910_v11 = vclz %v1909_v7  ;;  %v3950_v56 = vmov %v3947_v63  ;;  %vm1652_vm11 = vcmp.lt.s32.totalorder %v3951_v30, 0 }
 0x1fd   :  { %v1276_v50 = vsel %vm1274_vm5, %v3358_v18, %v3950_v56  ;;  %v3461_v21 = vmul.f32 0.5, %v816_v54  ;;  %v3465_v17 = vsel %vm962_vm6, nan, %v971_v42  ;;  %v1125_v19 = vsel %vm1118_vm14, %v1121_v47, %v1124_v12 }
 0x1fe   :  { %v3952_v8 = vand.u32 2147483647, %v3951_v30  ;;  %v1773_v31 = vsel %vm1652_vm11, %v1772_v4, %v1771_v40  ;;  %v2342_v18 = vadd.s32 4294967294, %v1910_v11  ;;  %v811_v16 = vadd.f32 %v2394_v45, %v2390_v22 }
 0x1ff   :  { %v812_v23 = vadd.f32 %v2396_v52, %v2392_v59  ;;  %v1280_v1 = vsel %vm1273_vm0, %v1276_v50, %v1279_v55  ;;  %v3956_v48 = vmov %v3949_v58  ;;  %v3491_v22 = vsel %vm1116_vm7, nan, %v1125_v19  ;;  %v1471_v19 = vpop.permute.xlu1 %1470 }
 0x200   :  { %vm3471_vm12 = vcmp.le.f32.partialorder %v3952_v8, 0.7853982  ;;  %v1431_v27 = vsel %vm1429_vm1, %v3371_v34, %v3956_v48  ;;  %vm2343_vm13 = vcmp.lt.s32.totalorder %v2342_v18, 0  ;;  %v1434_v45 = vsel %vm1432_vm8, %v1123_v60, %v3948_v44 }
 0x201   :  { %v3480_v28 = vsel %vm3471_vm12, %v3951_v30, %v1773_v31  ;;  %v1445_v59 = vmul.f32 %v3465_v17, %v3453_v26  ;;  %v1913_v52 = vsel %vm2343_vm13, 0, %v2342_v18  ;;  %v739_v34 = vmul.f32 %v3265_v9, %v3389_v15 }
 0x202   :  { %3955 = vst [vmem:[#allocation4_spill] sm:$0xff] %v3480_v28  ;;  %v3500_v0 = vmul.f32 %v3480_v28, %v3480_v28  ;;  %v1446_v55 = vmul.f32 %v3491_v22, %v3461_v21  ;;  %v1898_v63 = vadd.s32 %v3330_v37, %v3333_v51  ;;  %v1914_v57 = vsub.s32 32, %v1913_v52 }
 0x203   :  { %v740_v60 = vmul.f32 %v3265_v9, %v3443_v20  ;;  %v813_v53 = vmul.f32 0.5, %v811_v16  ;;  %v1918_v3 = vsub.s32 4294967266, %v1913_v52  ;;  %v814_v6 = vmul.f32 0.5, %v812_v23 }
 0x204   :  { %3957 = vst [vmem:[#allocation2_spill] sm:$0xff] %v3500_v0  ;;  %v1281_v10 = vsel %vm962_vm6, nan, %v1280_v1  ;;  %v1435_v54 = vsel %vm1428_vm10, %v1431_v27, %v1434_v45  ;;  %v1916_v40 = vshrl.u32 %v1898_v63, %v1914_v57  ;;  %v752_v42 = vmul.f32 %v3265_v9, %v3376_v62 }
 0x205   :  { %v753_v37 = vmul.f32 %v3265_v9, %v3411_v39  ;;  %v3518_v51 = vsub.f32 0.0, %v1445_v59  ;;  %v1786_v44 = vmul.f32 -0.00019511016, %v3500_v0  ;;  %v1915_v58 = vshll.u32 %v3414_v49, %v1913_v52 }
 0x206   :  { %v1919_v47 = vadd.s32 127, %v1918_v3  ;;  %v3522_v7 = vsub.f32 0.0, %v1446_v55  ;;  %v1774_v29 = vsub.s32 4, %v3293_v13  ;;  %v1436_v25 = vsel %vm1116_vm7, nan, %v1435_v54 }
 0x207   :  { %v1439_v12 = vsub.f32 0.0, %v1281_v10  ;;  %v3527_v4 = vmul.f32 %v1281_v10, %v813_v53  ;;  %v1917_v11 = vor.u32 %v1916_v40, %v1915_v58  ;;  %v746_v9 = vmul.f32 %v744_v35, %v3376_v62 }
 0x208   :  { %v1920_v56 = vshll.u32 %v1919_v47, 23  ;;  %v3530_v50 = vmul.f32 %v1436_v25, %v814_v6  ;;  %v1779_v49 = vmul.f32 -0.001358992, %v3500_v0  ;;  %v747_v8 = vmul.f32 %v744_v35, %v3411_v39 }
 0x209   :  { %v1473_v31 = vmul.f32 %v1471_v19, %v3518_v51  ;;  %v1483_v46 = vmul.f32 %v3335_v32, %v3518_v51  ;;  %v1787_v18 = vadd.f32 0.008332121, %v1786_v44  ;;  %v1474_v23 = vmul.f32 %v1471_v19, %v3522_v7 }
 0x20a   :  { %v1921_v16 = vor.u32 4788187, %v1920_v56  ;;  %v1484_v1 = vmul.f32 %v3335_v32, %v3522_v7  ;;  %v750_v48 = vmul.f32 %v744_v35, %v3389_v15  ;;  %v751_v27 = vmul.f32 %v744_v35, %v3443_v20  ;;  %v3958_v56 = vld [vmem:[#allocation6_spill] sm:$0xff] }
 0x20b   :  { %v1479_v45 = vmul.f32 %v3335_v32, %v3527_v4  ;;  %v1485_v59 = vmul.f32 %v1471_v19, %v3527_v4  ;;  %v1924_v55 = vcvt.s32.f32 %v1917_v11  ;;  %v1480_v63 = vmul.f32 %v3335_v32, %v3530_v50 }
 0x20c   :  { %v1922_v52 = vand.u32 2147483647, %v1921_v16  ;;  %v1486_v57 = vmul.f32 %v1471_v19, %v3530_v50  ;;  %v1780_v3 = vadd.f32 0.041655596, %v1779_v49  ;;  %v1440_v10 = vsub.f32 0.0, %v1436_v25 }
 0x20d   :  { %v3548_v54 = vsub.f32 %v1473_v31, %v1479_v45  ;;  %v1487_v40 = vadd.f32 %v1485_v59, %v1483_v46  ;;  %v1788_v44 = vmul.f32 %v1787_v18, %v3500_v0  ;;  %v3551_v58 = vsub.f32 %v1474_v23, %v1480_v63 }
 0x20e   :  { %v1925_v35 = vmul.f32 %v1924_v55, %v1922_v52  ;;  %v1488_v47 = vadd.f32 %v1486_v57, %v1484_v1  ;;  %v1775_v11 = vsel %vm1652_vm11, %v1774_v29, %v3293_v13  ;;  %vm1806_vm2 = vcmp.lt.s32.totalorder %v3958_v56, 0 }
 0x20f   :  { %v748_v32 = vsub.f32 %v739_v34, %v746_v9  ;;  %v754_v16 = vadd.f32 %v752_v42, %v750_v48  ;;  %v749_v49 = vsub.f32 %v740_v60, %v747_v8  ;;  %v755_v25 = vadd.f32 %v753_v37, %v751_v27 }
 0x210   :  { %v1926_v19 = vxor.u32 2147483648, %v1925_v35  ;;  %v3558_v31 = vmul.f32 %v3465_v17, %v813_v53  ;;  %v1781_v46 = vmul.f32 %v1780_v3, %v3500_v0  ;;  %v3562_v18 = vmul.f32 %v1439_v12, %v3453_v26 }
 0x211   :  { %v3565_v23 = vmul.f32 %v3548_v54, %v748_v32  ;;  %v3567_v1 = vmul.f32 %v1487_v40, %v754_v16  ;;  %v1789_v13 = vadd.f32 -0.16666654, %v1788_v44  ;;  %v3570_v34 = vmul.f32 %v3491_v22, %v814_v6 }
 0x212   :  { %v3573_v60 = vmul.f32 %v3551_v58, %v749_v49  ;;  %v3575_v42 = vmul.f32 %v1488_v47, %v755_v25  ;;  %v1507_v17 = vmul.f32 %v1487_v40, %v748_v32  ;;  %v1508_v53 = vmul.f32 %v1488_v47, %v749_v49 }
 0x213   :  { %v1509_v37 = vmul.f32 %v3548_v54, %v754_v16  ;;  %v1510_v26 = vmul.f32 %v3551_v58, %v755_v25  ;;  %v3581_v29 = vmul.f32 %v3396_v38, %v3443_v20  ;;  %v3959_v12 = vand.u32 2147483647, %v3958_v56 }
 0x214   :  { %v3960_v22 = vmov 0  ;;  %v1927_v6 = vsel %vm1806_vm2, %v1926_v19, %v1925_v35  ;;  %v3592_v9 = vmul.f32 %v1440_v10, %v3461_v21  ;;  %v3596_v8 = vsel %vm3471_vm12, 0, %v1775_v11  ;;  %v3967_v11 = vld [vmem:[#allocation8_spill] sm:$0xff] }
 0x215   :  { %vm3585_vm3 = vcmp.le.f32.partialorder %v3959_v12, 0.7853982  ;;  %3963 = vst [vmem:[#allocation3_spill] sm:$0xff] %v3596_v8  ;;  %v3598_v48 = vadd.f32 -0.4999988, %v1781_v46  ;;  %v3604_v45 = vmul.f32 %v1789_v13, %v3500_v0  ;;  %v3609_v21 = vmul.f32 %v3558_v31, %v748_v32  ;;  %v1457_v13 = vpop.permute.xlu0 %1456 }
 0x216   :  { %v3961_v22 = vsel %vm3585_vm3, 4294967295, %v3960_v22  ;;  %v3612_v33 = vmul.f32 %v3570_v34, %v749_v49  ;;  %v3617_v52 = vsel %vm3585_vm3, %v3958_v56, %v1927_v6  ;;  %v3619_v55 = vadd.f32 %v1509_v37, %v1507_v17 }
 0x217   :  { %3962 = vst [vmem:[#allocation7_spill] sm:$0xff] %v3961_v22  ;;  %v3621_v63 = vadd.f32 %v1510_v26, %v1508_v53  ;;  %v3624_v57 = vmul.f32 %v3562_v18, %v754_v16  ;;  %v3627_v3 = vmul.f32 %v3592_v9, %v755_v25  ;;  %v1535_v10 = vmul.f32 %v3562_v18, %v748_v32 }
 0x218   :  { %3964 = vst [vmem:[#allocation10_spill] sm:$0xff] %v3598_v48  ;;  %v1536_v44 = vmul.f32 %v3592_v9, %v749_v49  ;;  %v1537_v35 = vmul.f32 %v3558_v31, %v754_v16  ;;  %v3634_v19 = vmul.f32 %v3548_v54, %v3967_v11  ;;  %v3637_v46 = vmul.f32 %v1487_v40, %v3394_v24 }
 0x219   :  { %3965 = vst [vmem:[#allocation11_spill] sm:$0xff] %v3604_v45  ;;  %v1453_v17 = vmul.f32 %v3303_v2, %v3518_v51  ;;  %v1454_v53 = vmul.f32 %v3303_v2, %v3522_v7  ;;  %v3645_v32 = vmul.f32 %v3617_v52, %v3617_v52  ;;  %v1538_v16 = vmul.f32 %v3570_v34, %v755_v25 }
 0x21a   :  { %3966 = vst [vmem:[#allocation12_spill] sm:$0xff] %v3617_v52  ;;  %v3650_v49 = vmul.f32 %v3551_v58, %v3404_v36  ;;  %v1459_v37 = vmul.f32 %v1457_v13, %v3527_v4  ;;  %v1460_v26 = vmul.f32 %v1457_v13, %v3530_v50  ;;  %v1463_v12 = vmul.f32 %v1457_v13, %v3518_v51 }
 0x21b   :  { %3968 = vst [vmem:[#allocation8_spill] sm:$0xff] %v3634_v19  ;;  %v1464_v6 = vmul.f32 %v1457_v13, %v3522_v7  ;;  %v1465_v38 = vmul.f32 %v3303_v2, %v3527_v4  ;;  %v3659_v59 = vmul.f32 %v1488_v47, %v3433_v41  ;;  %v1563_v25 = vmul.f32 %v1487_v40, %v3967_v11 }
 0x21c   :  { %3969 = vst [vmem:[#allocation13_spill] sm:$0xff] %v3637_v46  ;;  %v3662_v27 = vsub.f32 %v1453_v17, %v1459_v37  ;;  %v1466_v30 = vmul.f32 %v3303_v2, %v3530_v50  ;;  %v1564_v51 = vmul.f32 %v1488_v47, %v3404_v36  ;;  %v3669_v22 = vsub.f32 %v1454_v53, %v1460_v26 }
 0x21d   :  { %3970 = vst [vmem:[#allocation14_spill] sm:$0xff] %v3650_v49  ;;  %v3671_v7 = vadd.f32 %v1465_v38, %v1463_v12  ;;  %v1940_v4 = vmul.f32 -0.00019511016, %v3645_v32  ;;  %v1489_v13 = vmul.f32 %v3558_v31, %v3967_v11  ;;  %v1490_v40 = vmul.f32 %v3570_v34, %v3404_v36 }
 0x21e   :  { %3971 = vst [vmem:[#allocation15_spill] sm:$0xff] %v3659_v59  ;;  %v3678_v17 = vadd.f32 %v1466_v30, %v1464_v6  ;;  %v1491_v2 = vmul.f32 %v3562_v18, %v3394_v24  ;;  %v1517_v50 = vmul.f32 %v3662_v27, %v3967_v11  ;;  %v1518_v47 = vmul.f32 %v3669_v22, %v3404_v36 }
 0x21f   :  { %v1519_v38 = vmul.f32 %v3671_v7, %v3394_v24  ;;  %v1492_v53 = vmul.f32 %v3592_v9, %v3433_v41  ;;  %v1495_v37 = vmul.f32 %v3562_v18, %v3967_v11  ;;  %v1523_v26 = vmul.f32 %v3671_v7, %v3967_v11 }
 0x220   :  { %3972 = vst [vmem:[#allocation16_spill] sm:$0xff] %v3678_v17  ;;  %v1520_v30 = vmul.f32 %v3678_v17, %v3433_v41  ;;  %v1497_v12 = vmul.f32 %v3558_v31, %v3394_v24  ;;  %v1524_v6 = vmul.f32 %v3678_v17, %v3404_v36  ;;  %v1525_v52 = vmul.f32 %v3662_v27, %v3394_v24 }
 0x221   :  { %v1526_v8 = vmul.f32 %v3669_v22, %v3433_v41  ;;  %v1941_v28 = vadd.f32 0.008332121, %v1940_v4  ;;  %v1496_v0 = vmul.f32 %v3592_v9, %v3404_v36  ;;  %v1498_v11 = vmul.f32 %v3570_v34, %v3433_v41 }
 0x222   :  { %v1565_v56 = vmul.f32 %v3548_v54, %v3394_v24  ;;  %v1566_v61 = vmul.f32 %v3551_v58, %v3433_v41  ;;  %v1521_v45 = vsub.f32 %v1517_v50, %v1519_v38  ;;  %v1522_v46 = vsub.f32 %v1518_v47, %v1520_v30  ;;  %v758_v47 = vpop.permute.xlu1 %757 }
 0x223   :  { %v1933_v19 = vmul.f32 -0.001358992, %v3645_v32  ;;  %v3715_v4 = vsub.f32 %v1489_v13, %v1491_v2  ;;  %v1527_v17 = vadd.f32 %v1525_v52, %v1523_v26  ;;  %v1528_v48 = vadd.f32 %v1526_v8, %v1524_v6  ;;  %v3976_v6 = vld [vmem:[#allocation8_spill] sm:$0xff] }
 0x224   :  { %v1494_v59 = vsub.f32 %v1490_v40, %v1492_v53  ;;  %v3717_v49 = vadd.f32 %v1497_v12, %v1495_v37  ;;  %v1533_v36 = vsub.f32 %v3609_v21, %v3624_v57  ;;  %v1534_v24 = vsub.f32 %v3612_v33, %v3627_v3 }
 0x225   :  { %v1942_v54 = vmul.f32 %v1941_v28, %v3645_v32  ;;  %v3724_v41 = vadd.f32 %v1498_v11, %v1496_v0  ;;  %v1539_v58 = vadd.f32 %v1537_v35, %v1535_v10  ;;  %v1540_v50 = vadd.f32 %v1538_v16, %v1536_v44 }
 0x226   :  { %v3973_v8 = vsub.f32 %v3565_v23, %v3567_v1  ;;  %v3974_v13 = vsub.f32 %v3573_v60, %v3575_v42  ;;  %v1541_v21 = vadd.f32 %v1533_v36, %v1521_v45  ;;  %v1542_v57 = vadd.f32 %v1534_v24, %v1522_v46  ;;  %v3979_v24 = vld [vmem:[#allocation14_spill] sm:$0xff] }
 0x227   :  { %v1515_v33 = vadd.f32 %v3619_v55, %v3717_v49  ;;  %v1516_v28 = vadd.f32 %v3621_v63, %v3724_v41  ;;  %v1543_v0 = vadd.f32 %v1539_v58, %v1527_v17  ;;  %v1544_v3 = vadd.f32 %v1540_v50, %v1528_v48  ;;  %v3975_v2 = vld [vmem:[#allocation16_spill] sm:$0xff] }
 0x228   :  { %v1513_v52 = vadd.f32 %v3973_v8, %v3715_v4  ;;  %v1514_v40 = vadd.f32 %v3974_v13, %v1494_v59  ;;  %v1567_v10 = vadd.f32 %v1565_v56, %v1563_v25  ;;  %v1568_v44 = vadd.f32 %v1566_v61, %v1564_v51 }
 0x229   :  { %v760_v35 = vmul.f32 %v758_v47, %v3389_v15  ;;  %v761_v23 = vmul.f32 %v758_v47, %v3443_v20  ;;  %v1934_v1 = vadd.f32 0.041655596, %v1933_v19  ;;  %v1943_v16 = vadd.f32 -0.16666654, %v1942_v54  ;;  %v3980_v54 = vld [vmem:[#allocation15_spill] sm:$0xff] }
 0x22a   :  { %v773_v60 = vmul.f32 %v758_v47, %v3376_v62  ;;  %v774_v42 = vmul.f32 %v758_v47, %v3411_v39  ;;  %v1589_v45 = vadd.f32 %v1541_v21, %v1513_v52  ;;  %v1590_v46 = vadd.f32 %v1542_v57, %v1514_v40  ;;  %v3982_v52 = vld [vmem:[#allocation11_spill] sm:$0xff] }
 0x22b   :  { %v769_v55 = vsub.f32 %v760_v35, %v3424_v43  ;;  %v770_v63 = vsub.f32 %v761_v23, %v3447_v5  ;;  %v1595_v17 = vadd.f32 %v1543_v0, %v1515_v33  ;;  %v1596_v48 = vadd.f32 %v1544_v3, %v1516_v28 }
 0x22c   :  { %v775_v61 = vadd.f32 %v773_v60, %v3428_v14  ;;  %v776_v15 = vadd.f32 %v774_v42, %v3581_v29  ;;  %v3981_v58 = vsub.f32 %v3979_v24, %v3980_v54  ;;  %v1791_v13 = vadd.f32 1.0, %v3982_v52  ;;  %v3983_v42 = vld [vmem:[#allocation9_spill] sm:$0xff] }
 0x22d   :  { %v1545_v20 = vmul.f32 %v3558_v31, %v769_v55  ;;  %v1546_v56 = vmul.f32 %v3570_v34, %v770_v63  ;;  %v1551_v62 = vmul.f32 %v3562_v18, %v769_v55  ;;  %v1552_v39 = vmul.f32 %v3592_v9, %v770_v63  ;;  %v3992_v54 = vld [vmem:[#allocation5_spill] sm:$0xff] }
 0x22e   :  { %v1547_v19 = vmul.f32 %v3562_v18, %v775_v61  ;;  %v1548_v43 = vmul.f32 %v3592_v9, %v776_v15  ;;  %v1553_v5 = vmul.f32 %v3558_v31, %v775_v61  ;;  %v1554_v25 = vmul.f32 %v3570_v34, %v776_v15  ;;  %v3977_v34 = vld [vmem:[#allocation13_spill] sm:$0xff] }
 0x22f   :  { %v1573_v14 = vmul.f32 %v3662_v27, %v769_v55  ;;  %v1574_v29 = vmul.f32 %v3669_v22, %v770_v63  ;;  %v1575_v51 = vmul.f32 %v3671_v7, %v775_v61  ;;  %v1576_v38 = vmul.f32 %v3975_v2, %v776_v15 }
 0x230   :  { %v1549_v53 = vsub.f32 %v1545_v20, %v1547_v19  ;;  %v1550_v37 = vsub.f32 %v1546_v56, %v1548_v43  ;;  %v1555_v30 = vadd.f32 %v1553_v5, %v1551_v62  ;;  %v1556_v26 = vadd.f32 %v1554_v25, %v1552_v39 }
 0x231   :  { %v1577_v12 = vsub.f32 %v1573_v14, %v1575_v51  ;;  %v1578_v18 = vsub.f32 %v1574_v29, %v1576_v38  ;;  %v1579_v9 = vmul.f32 %v3671_v7, %v769_v55  ;;  %v1580_v31 = vmul.f32 %v3975_v2, %v770_v63 }
 0x232   :  { %v3978_v11 = vsub.f32 %v3976_v6, %v3977_v34  ;;  %v1570_v50 = vadd.f32 %v3981_v58, %v1550_v37  ;;  %v1571_v47 = vadd.f32 %v1567_v10, %v1555_v30  ;;  %v1572_v8 = vadd.f32 %v1568_v44, %v1556_v26  ;;  %v3985_v44 = vld [vmem:[#allocation6_spill] sm:$0xff]  ;;  %v3991_v30 = vld [vmem:[#allocation12_spill] sm:$0xff] }
 0x233   :  { %v1935_v40 = vmul.f32 %v1934_v1, %v3645_v32  ;;  %v1581_v21 = vmul.f32 %v3662_v27, %v775_v61  ;;  %v1582_v7 = vmul.f32 %v3669_v22, %v776_v15  ;;  %v1585_v57 = vadd.f32 %v1577_v12, %v3715_v4  ;;  %v3986_v4 = vld [vmem:[#allocation2_spill] sm:$0xff]  ;;  %v3989_v15 = vld [vmem:[#allocation3_spill] sm:$0xff] }
 0x234   :  { %v1569_v36 = vadd.f32 %v3978_v11, %v1549_v53  ;;  %v1586_v33 = vadd.f32 %v1578_v18, %v1494_v59  ;;  %v1592_v0 = vadd.f32 %v1590_v46, %v1570_v50  ;;  %v1597_v23 = vadd.f32 %v1595_v17, %v1571_v47  ;;  %v3987_v59 = vld [vmem:[#allocation10_spill] sm:$0xff] }
 0x235   :  { %v1583_v3 = vadd.f32 %v1581_v21, %v1579_v9  ;;  %v1584_v35 = vadd.f32 %v1582_v7, %v1580_v31  ;;  %v1598_v60 = vadd.f32 %v1596_v48, %v1572_v8  ;;  %v3984_v10 = vsub.s32 4, %v3983_v42  ;;  %v3988_v48 = vld [vmem:[#allocation4_spill] sm:$0xff]  ;;  %v3814_v8 = vld [vmem:[%s3857_s1] sm:$0x3] }
 0x236   :  { %v1591_v28 = vadd.f32 %v1589_v45, %v1569_v36  ;;  %v1944_v1 = vmul.f32 %v1943_v16, %v3645_v32  ;;  %v3778_v22 = vadd.f32 %v1592_v0, %v1586_v33  ;;  %v1783_v45 = vmul.f32 %v3987_v59, %v3986_v4 }
 0x237   :  { %v1929_v55 = vsel %vm1806_vm2, %v3984_v10, %v3983_v42  ;;  %v1936_v46 = vadd.f32 -0.4999988, %v1935_v40  ;;  %v1587_v63 = vadd.f32 %v1583_v3, %v3717_v49  ;;  %v1588_v17 = vadd.f32 %v1584_v35, %v3724_v41 }
 0x238   :  { %v3776_v27 = vadd.f32 %v1591_v28, %v1585_v57  ;;  %v1792_v61 = vmul.f32 %v1791_v13, %v3988_v48  ;;  %v2102_v20 = vadd.s32 3, %v3989_v15  ;;  %v1602_v39 = vmul.f32 %v3778_v22, %v3778_v22 }
 0x239   :  { %v3786_v56 = vadd.f32 %v1597_v23, %v1587_v63  ;;  %v3788_v62 = vadd.f32 %v1598_v60, %v1588_v17  ;;  %v1931_v43 = vsel %vm3585_vm3, 0, %v1929_v55  ;;  %v1945_v49 = vadd.f32 1.0, %v1944_v1 }
 0x23a   :  { %v1601_v16 = vmul.f32 %v3776_v27, %v3776_v27  ;;  %v1784_v5 = vadd.f32 1.0, %v1783_v45  ;;  %v1937_v41 = vmul.f32 %v1936_v46, %v3645_v32  ;;  %v1794_v29 = vand.u32 3, %v3989_v15 }
 0x23b   :  { %v1603_v25 = vmul.f32 %v3786_v56, %v3786_v56  ;;  %v1604_v14 = vmul.f32 %v3788_v62, %v3788_v62  ;;  %v2103_v51 = vand.u32 3, %v2102_v20  ;;  %v1797_v2 = vxor.u32 2147483648, %v1792_v61 }
 0x23c   :  { %v2257_v38 = vadd.s32 3, %v1931_v43  ;;  %v1946_v26 = vmul.f32 %v1945_v49, %v3991_v30  ;;  %v1800_v12 = vxor.u32 2147483648, %v1784_v5  ;;  %v1938_v18 = vadd.f32 1.0, %v1937_v41 }
 0x23d   :  { %v3802_v53 = vadd.f32 %v1603_v25, %v1601_v16  ;;  %v3804_v37 = vadd.f32 %v1604_v14, %v1602_v39  ;;  %vm1796_vm4 = vcmp.eq.s32.totalorder %v1794_v29, 0  ;;  %vm2105_vm5 = vcmp.eq.s32.totalorder %v2103_v51, 0  ;;  %v2281_v16 = vld [vmem:[%s3858_s2] sm:$0x3] }
 0x23e   :  { %v1798_v32 = vsel %vm1796_vm4, %v1784_v5, %v1797_v2  ;;  %v1948_v9 = vand.u32 3, %v1931_v43  ;;  %v2107_v31 = vsel %vm2105_vm5, %v1784_v5, %v1797_v2  ;;  %v2258_v6 = vand.u32 3, %v2257_v38 }
 0x23f   :  { %2397 = vrcp.f32 %v3802_v53  ;;  %vm1795_vm6 = vcmp.lt.s32.totalorder %v1794_v29, 2  ;;  %vm1799_vm14 = vcmp.eq.s32.totalorder %v1794_v29, 2  ;;  %v1951_v34 = vxor.u32 2147483648, %v1946_v26 }
 0x240   :  { %2399 = vrcp.f32 %v3804_v37  ;;  %vm2108_vm15 = vcmp.eq.s32.totalorder %v2103_v51, 2  ;;  %v1801_v11 = vsel %vm1799_vm14, %v1800_v12, %v1792_v61  ;;  %v1954_v36 = vxor.u32 2147483648, %v1938_v18 }
 0x241   :  { %vm2104_vm0 = vcmp.lt.s32.totalorder %v2103_v51, 2  ;;  %v2110_v24 = vsel %vm2108_vm15, %v1800_v12, %v1792_v61  ;;  %vm1793_vm1 = vweird.f32 %v3992_v54  ;;  %v1802_v58 = vsel %vm1795_vm6, %v1798_v32, %v1801_v11 }
 0x242   :  { %vm1947_vm7 = vweird.f32 %v3985_v44  ;;  %v2111_v50 = vsel %vm2104_vm0, %v2107_v31, %v2110_v24  ;;  %vm1949_vm8 = vcmp.lt.s32.totalorder %v1948_v9, 2  ;;  %vm1950_vm9 = vcmp.eq.s32.totalorder %v1948_v9, 0 }
 0x243   :  { %vm1953_vm10 = vcmp.eq.s32.totalorder %v1948_v9, 2  ;;  %vm2259_vm11 = vcmp.lt.s32.totalorder %v2258_v6, 2  ;;  %v1952_v13 = vsel %vm1950_vm9, %v1938_v18, %v1951_v34  ;;  %vm2260_vm12 = vcmp.eq.s32.totalorder %v2258_v6, 0 }
 0x244   :  { %vm2263_vm13 = vcmp.eq.s32.totalorder %v2258_v6, 2  ;;  %v1803_v21 = vsel %vm1793_vm1, nan, %v1802_v58  ;;  %v1955_v7 = vsel %vm1953_vm10, %v1954_v36, %v1946_v26  ;;  %v2112_v57 = vsel %vm1793_vm1, nan, %v2111_v50 }
 0x245   :  { %v2398_v47 = vpop.eup %2397  ;;  %v2262_v28 = vsel %vm2260_vm12, %v1938_v18, %v1951_v34  ;;  %v2265_v0 = vsel %vm2263_vm13, %v1954_v36, %v1946_v26  ;;  %v2283_v3 = vperm.slane %v3814_v8, 0  ;;  %v1956_v23 = vsel %vm1949_vm8, %v1952_v13, %v1955_v7 }
 0x246   :  { %v2400_v52 = vpop.eup %2399  ;;  %v1608_v40 = vmul.f32 %v2398_v47, %v3802_v53  ;;  %v2284_v60 = vperm.slane %v3814_v8, 1  ;;  %v1618_v42 = vand.u32 2147483648, %v3802_v53  ;;  %vm1613_vm2 = vweird.f32 %v2398_v47 }
 0x247   :  { %v1622_v33 = vmul.f32 %v2400_v52, %v3804_v37  ;;  %v1616_v1 = vand.u32 2147483647, %v3802_v53  ;;  %v1632_v4 = vand.u32 2147483648, %v3804_v37  ;;  %v2266_v59 = vsel %vm2259_vm11, %v2262_v28, %v2265_v0 }
 0x248   :  { %v1609_v35 = vsub.f32 1.0, %v1608_v40  ;;  %vm1627_vm3 = vweird.f32 %v2400_v52  ;;  %v1630_v46 = vand.u32 2147483647, %v3804_v37  ;;  %v1957_v63 = vsel %vm1947_vm7, nan, %v1956_v23 }
 0x249   :  { %v1623_v10 = vsub.f32 1.0, %v1622_v33  ;;  %vm1612_vm4 = vweird.f32 %v3802_v53  ;;  %v1635_v48 = vmul.f32 2.0, %v3776_v27  ;;  %v1619_v61 = vor.u32 1.1754944e-38, %v1618_v42 }
 0x24a   :  { %v1610_v55 = vmul.f32 %v2398_v47, %v1609_v35  ;;  %vm1614_vm5 = vmor %vm1612_vm4, %vm1613_vm2  ;;  %vm1626_vm6 = vweird.f32 %v3804_v37  ;;  %v1636_v20 = vmul.f32 2.0, %v3778_v22  ;;  %vm1617_vm14 = vcmp.eq.f32.partialorder %v1616_v1, 8.507059e+37 }
 0x24b   :  { %v1624_v45 = vmul.f32 %v2400_v52, %v1623_v10  ;;  %vm1628_vm15 = vmor %vm1626_vm6, %vm1627_vm3  ;;  %v1633_v19 = vor.u32 1.1754944e-38, %v1632_v4  ;;  %v1639_v43 = vmul.f32 -2.0, %v3786_v56  ;;  %vm1631_vm0 = vcmp.eq.f32.partialorder %v1630_v46, 8.507059e+37 }
 0x24c   :  { %v1611_v17 = vadd.f32 %v2398_v47, %v1610_v55  ;;  %v1640_v27 = vmul.f32 -2.0, %v3788_v62  ;;  %v2267_v41 = vsel %vm1947_vm7, nan, %v2266_v59  ;;  %v2290_v29 = vperm.slane %v2281_v16, 0 }
 0x24d   :  { %v1625_v15 = vadd.f32 %v2400_v52, %v1624_v45  ;;  %v2291_v51 = vperm.slane %v2281_v16, 1 }
 0x24e   :  { %v1615_v39 = vsel %vm1614_vm5, %v2398_v47, %v1611_v17 }
 0x24f   :  { %v1620_v49 = vsel %vm1617_vm14, %v1619_v61, %v1615_v39  ;;  %v1629_v5 = vsel %vm1628_vm15, %v2400_v52, %v1625_v15 }
 0x250   :  { %v1634_v25 = vsel %vm1631_vm0, %v1633_v19, %v1629_v5  ;;  %v1637_v22 = vmul.f32 %v1635_v48, %v1620_v49  ;;  %v1641_v14 = vmul.f32 %v1639_v43, %v1620_v49 }
 0x251   :  { %v1638_v2 = vmul.f32 %v1636_v20, %v1634_v25  ;;  %v1642_v38 = vmul.f32 %v1640_v27, %v1634_v25 }
 0x252   :  { %v2268_v53 = vmul.f32 %v1803_v21, %v1637_v22  ;;  %v2270_v37 = vmul.f32 %v2112_v57, %v1641_v14  ;;  %v2274_v30 = vmul.f32 %v2112_v57, %v1637_v22  ;;  %v2276_v26 = vmul.f32 %v1803_v21, %v1641_v14 }
 0x253   :  { %v2269_v56 = vmul.f32 %v1957_v63, %v1638_v2  ;;  %v2271_v12 = vmul.f32 %v2267_v41, %v1642_v38  ;;  %v2275_v18 = vmul.f32 %v2267_v41, %v1638_v2  ;;  %v2277_v32 = vmul.f32 %v1957_v63, %v1642_v38 }
 0x254   :  { %v2272_v9 = vsub.f32 %v2268_v53, %v2270_v37  ;;  %v2278_v62 = vadd.f32 %v2276_v26, %v2274_v30 }
 0x255   :  { %v2273_v31 = vsub.f32 %v2269_v56, %v2271_v12  ;;  %v2279_v44 = vadd.f32 %v2277_v32, %v2275_v18 }
 0x256   :  { %v2287_v6 = vmul.f32 %v2283_v3, %v2272_v9  ;;  %v2294_v34 = vmul.f32 %v2290_v29, %v2278_v62  ;;  %v2300_v11 = vmul.f32 %v2290_v29, %v2272_v9  ;;  %v2302_v36 = vmul.f32 %v2283_v3, %v2278_v62 }
 0x257   :  { %v2288_v24 = vmul.f32 %v2284_v60, %v2273_v31  ;;  %v2295_v54 = vmul.f32 %v2291_v51, %v2279_v44  ;;  %v2301_v58 = vmul.f32 %v2291_v51, %v2273_v31  ;;  %v2303_v50 = vmul.f32 %v2284_v60, %v2279_v44 }
 0x258   :  { %v2296_v47 = vsub.f32 %v2287_v6, %v2294_v34  ;;  %v2304_v8 = vadd.f32 %v2302_v36, %v2300_v11 }
 0x259   :  { %v2297_v52 = vsub.f32 %v2288_v24, %v2295_v54  ;;  %v2305_v13 = vadd.f32 %v2303_v50, %v2301_v58 }
 0x25a   :  { %2298 = vst [vmem:[%s3859_s4] sm:$0xff] %v2296_v47 }
 0x25b   :  { %2299 = vst [vmem:[%s3859_s4 + $0x8] sm:$0xff] %v2297_v52 }
 0x25c   :  { %2306 = vst [vmem:[%s3859_s4 + $0x10] sm:$0xff] %v2304_v8 }
 0x25d   :  { %2307 = vst [vmem:[%s3859_s4 + $0x18] sm:$0xff] %v2305_v13 }

</bundles_post_ra>
